<compile_context>
chip_gen: v7x
topology: tpu7x:2x2x1
jax: 0.10.0
libtpu: 0.0.40
codegen_flags: <defaults>
</compile_context>

<pallas_src>
import jax
import jax.numpy as jnp
from jax.experimental import pallas as pl
from jax.experimental.pallas import tpu as pltpu

LN_EPS = 1e-6
LEAKY_SLOPE = 0.01
TILE = 128                      # node row/column tile (MXU + lane friendly)
VMEM_LIMIT = 48 * 1024 * 1024   # headroom vs. v7x's 64 MiB physical VMEM


def _round_up(x, m):
    return (x + m - 1) // m * m


# ---------------------------------------------------------------------------
# Kernel 1: LayerNorm + fused  xn @ [W_i | W_ii | W_iii | W_a]
# ---------------------------------------------------------------------------
def _ln_xw_kernel(x_ref, gamma_ref, beta_ref, wcat_ref, xn_ref, xw_ref):
    h = x_ref.shape[-1]
    x = x_ref[...].astype(jnp.float32)

    # LayerNorm over the feature axis (elementwise math stays f32; rsqrt -> EUP).
    mean = jnp.mean(x, axis=-1, keepdims=True)
    centered = x - mean
    var = jnp.mean(centered * centered, axis=-1, keepdims=True)
    xn = centered * jax.lax.rsqrt(var + LN_EPS)
    xn = xn * gamma_ref[...] + beta_ref[...]
    xn_ref[...] = xn

    # One wide MXU matmul [tm,H]@[H,4H] instead of four small [tm,H]@[H,H].
    # TODO(synk): dropout (VariationalNormalEpanechnikovDropout) = identity here.
    xw = jnp.dot(xn.astype(wcat_ref.dtype), wcat_ref[...],
                 preferred_element_type=jnp.float32)
    for b in range(4):  # static, lane-aligned slices (H is a multiple of 128 in the demo)
        xw_ref[b, :, :] = xw[:, b * h:(b + 1) * h].astype(xw_ref.dtype)


# ---------------------------------------------------------------------------
# Kernel 2: gcn_out = sum_b A_b @ (xn W_b)  + residual + FeedForward + residual
# grid = (row tiles, 4 branches, col tiles); (branch, col) are the reduction axes.
# ---------------------------------------------------------------------------
def _gcn_ff_kernel(adj_ref, xw_ref, xn_ref, w1_ref, b1_ref, w2_ref, b2_ref,
                   out_ref, acc_ref):
    b = pl.program_id(1)
    k = pl.program_id(2)

    @pl.when(jnp.logical_and(b == 0, k == 0))
    def _():
        acc_ref[...] = jnp.zeros_like(acc_ref)

    # bf16 operands, f32 accumulation on the MXU.
    acc_ref[...] += jnp.dot(adj_ref[...], xw_ref[...],
                            preferred_element_type=jnp.float32)

    @pl.when(jnp.logical_and(b == pl.num_programs(1) - 1,
                             k == pl.num_programs(2) - 1))
    def _():
        h = xn_ref[...] + acc_ref[...]        # residual on the LN-ed states (as in the spec)
        inter = jnp.dot(h.astype(w1_ref.dtype), w1_ref[...],
                        preferred_element_type=jnp.float32) + b1_ref[...]
        inter = jnp.where(inter >= 0.0, inter, LEAKY_SLOPE * inter)   # LeakyReLU(0.01)
        ff = jnp.dot(inter.astype(w2_ref.dtype), w2_ref[...],
                     preferred_element_type=jnp.float32) + b2_ref[...]
        out_ref[...] = (h + ff).astype(out_ref.dtype)


# ---------------------------------------------------------------------------
# Wrappers
# ---------------------------------------------------------------------------
def _prepare_layer_params(params):
    w_cat = jnp.concatenate(
        [params["w_gcn_i"], params["w_gcn_ii"], params["w_gcn_iii"], params["w_gcn_a"]],
        axis=1).astype(jnp.bfloat16)
    return {
        "ln_gamma": params["ln_gamma"].astype(jnp.float32),
        "ln_beta": params["ln_beta"].astype(jnp.float32),
        "w_cat": w_cat,                                   # [H, 4H] bf16
        "ff_w1": params["ff_w1"].astype(jnp.bfloat16),    # [H, I]
        "ff_b1": params["ff_b1"].astype(jnp.float32),     # [1, I]
        "ff_w2": params["ff_w2"].astype(jnp.bfloat16),    # [I, H]
        "ff_b2": params["ff_b2"].astype(jnp.float32),     # [1, H]
    }


@jax.jit
def encoder_layer_forward(x_pad, adj_stacked, prep):
    """One EncoderLayer forward (two pipelined Pallas kernels)."""
    n_pad, h = x_pad.shape
    inter = prep["ff_w1"].shape[1]
    nm = n_pad // TILE
    nk = n_pad // TILE

    # ---- Phase 1: LayerNorm + fused xn @ W_cat -------------------------------
    xn, xw = pl.pallas_call(
        _ln_xw_kernel,
        out_shape=(jax.ShapeDtypeStruct((n_pad, h), jnp.float32),
                   jax.ShapeDtypeStruct((4, n_pad, h), jnp.bfloat16)),
        grid_spec=pltpu.PrefetchScalarGridSpec(
            num_scalar_prefetch=0,
            grid=(nm,),
            in_specs=[
                pl.BlockSpec((TILE, h), lambda i: (i, 0)),      # x row tile
                pl.BlockSpec((1, h), lambda i: (0, 0)),          # gamma
                pl.BlockSpec((1, h), lambda i: (0, 0)),          # beta
                pl.BlockSpec((h, 4 * h), lambda i: (0, 0)),      # W_cat (resident)
            ],
            out_specs=[
                pl.BlockSpec((TILE, h), lambda i: (i, 0)),       # xn
                pl.BlockSpec((4, TILE, h), lambda i: (0, i, 0)), # xw stacked
            ],
        ),
        compiler_params=pltpu.CompilerParams(
            dimension_semantics=("parallel",),
            vmem_limit_bytes=VMEM_LIMIT),
    )(x_pad, prep["ln_gamma"], prep["ln_beta"], prep["w_cat"])

    # ---- Phase 2: A-contraction + residual + FF + residual -------------------
    flops = 2 * n_pad * (4 * n_pad) * h + 4 * n_pad * h * inter
    bytes_accessed = (4 * n_pad * n_pad + 4 * n_pad * h) * 2 + 2 * n_pad * h * 4

    out = pl.pallas_call(
        _gcn_ff_kernel,
        out_shape=jax.ShapeDtypeStruct((n_pad, h), x_pad.dtype),
        grid_spec=pltpu.PrefetchScalarGridSpec(
            num_scalar_prefetch=0,
            grid=(nm, 4, nk),
            in_specs=[
                pl.BlockSpec((None, TILE, TILE), lambda i, b, k: (b, i, k)),  # A_b tile
                pl.BlockSpec((None, TILE, h), lambda i, b, k: (b, k, 0)),     # (xn W_b) tile
                pl.BlockSpec((TILE, h), lambda i, b, k: (i, 0)),              # xn row tile
                pl.BlockSpec((h, inter), lambda i, b, k: (0, 0)),             # FF W1
                pl.BlockSpec((1, inter), lambda i, b, k: (0, 0)),             # FF b1
                pl.BlockSpec((inter, h), lambda i, b, k: (0, 0)),             # FF W2
                pl.BlockSpec((1, h), lambda i, b, k: (0, 0)),                 # FF b2
            ],
            out_specs=pl.BlockSpec((TILE, h), lambda i, b, k: (i, 0)),
            scratch_shapes=[pltpu.VMEM((TILE, h), jnp.float32)],
        ),
        compiler_params=pltpu.CompilerParams(
            dimension_semantics=("parallel", "arbitrary", "arbitrary"),
            vmem_limit_bytes=VMEM_LIMIT),
        cost_estimate=pl.CostEstimate(
            flops=flops, transcendentals=0, bytes_accessed=bytes_accessed),
    )(adj_stacked, xw, xn,
      prep["ff_w1"], prep["ff_b1"], prep["ff_w2"], prep["ff_b2"])
    return out


def encoder_forward(hidden_states, adj_i, adj_ii, adj_iii, adj_a, layer_params,
                    output_hidden_states=False):
    """Encoder.forward: chain of EncoderLayers. Returns (hidden_states, all_hidden_states)."""
    n, _ = hidden_states.shape
    n_pad = _round_up(max(n, TILE), TILE)

    # Stack + zero-pad the dense adjacencies once (padded rows/cols contribute exactly 0),
    # cast to bf16 for the MXU and to halve HBM traffic.
    adj = jnp.stack([adj_i, adj_ii, adj_iii, adj_a]).astype(jnp.float32)
    adj = jnp.pad(adj, ((0, 0), (0, n_pad - n), (0, n_pad - n))).astype(jnp.bfloat16)

    x = jnp.pad(hidden_states, ((0, n_pad - n), (0, 0)))

    all_hidden_states = []
    for params in layer_params:
        if output_hidden_states:
            all_hidden_states.append(x[:n])
        prep = _prepare_layer_params(params)
        x = encoder_layer_forward(x, adj, prep)
    out = x[:n]
    if output_hidden_states:
        all_hidden_states.append(out)
    return out, all_hidden_states


def init_layer_params(key, hidden_size, intermediate_size):
    """Deterministic synthetic parameter init matching the module's shapes.

    Weights are stored pre-transposed as [in, out] so the kernel does x @ W.
    """
    ks = jax.random.split(key, 8)
    scale_h = 1.0 / jnp.sqrt(hidden_size)
    scale_i = 1.0 / jnp.sqrt(intermediate_size)
    return {
        "ln_gamma": jnp.ones((1, hidden_size), jnp.float32),
        "ln_beta": jnp.zeros((1, hidden_size), jnp.float32),
        # GCNConv linear weights (bias=False): [hidden, hidden]
        "w_gcn_i": jax.random.normal(ks[0], (hidden_size, hidden_size), jnp.float32) * scale_h,
        "w_gcn_ii": jax.random.normal(ks[1], (hidden_size, hidden_size), jnp.float32) * scale_h,
        "w_gcn_iii": jax.random.normal(ks[2], (hidden_size, hidden_size), jnp.float32) * scale_h,
        "w_gcn_a": jax.random.normal(ks[3], (hidden_size, hidden_size), jnp.float32) * scale_h,
        # FeedForward
        "ff_w1": jax.random.normal(ks[4], (hidden_size, intermediate_size), jnp.float32) * scale_h,
        "ff_b1": jax.random.normal(ks[5], (1, intermediate_size), jnp.float32) * 0.01,
        "ff_w2": jax.random.normal(ks[6], (intermediate_size, hidden_size), jnp.float32) * scale_i,
        "ff_b2": jax.random.normal(ks[7], (1, hidden_size), jnp.float32) * 0.01,
    }


if __name__ == "__main__":
    NUM_LAYERS = 2
    N_NODES = 256          # multiple of TILE -> no padding in the demo (padding path supported)
    HIDDEN = 128           # lane-dense feature width
    INTERMEDIATE = 256

    root = jax.random.PRNGKey(0)
    k_x, k_adj, k_params = jax.random.split(root, 3)

    # Node features [N, H]
    hidden_states = jax.random.normal(k_x, (N_NODES, HIDDEN), jnp.float32)

    # Four sparse-ish adjacency matrices, materialized dense [N, N]
    adj_keys = jax.random.split(k_adj, 8)

    def make_adj(kv, km):
        vals = jax.random.normal(kv, (N_NODES, N_NODES), jnp.float32)
        mask = jax.random.bernoulli(km, 0.25, (N_NODES, N_NODES))
        return jnp.where(mask, vals, 0.0)

    adj_i = make_adj(adj_keys[0], adj_keys[1])
    adj_ii = make_adj(adj_keys[2], adj_keys[3])
    adj_iii = make_adj(adj_keys[4], adj_keys[5])
    adj_a = make_adj(adj_keys[6], adj_keys[7])

    # Per-layer parameters
    layer_keys = jax.random.split(k_params, NUM_LAYERS)
    layer_params = [init_layer_params(k, HIDDEN, INTERMEDIATE) for k in layer_keys]

    out, all_hs = encoder_forward(
        hidden_states, adj_i, adj_ii, adj_iii, adj_a, layer_params,
        output_hidden_states=True)

    out = jax.block_until_ready(out)
    assert out.shape == (N_NODES, HIDDEN)
    assert len(all_hs) == NUM_LAYERS + 1
    assert jnp.all(jnp.isfinite(out))
    print("KERNEL_OK")
</pallas_src>

<mosaic_0001>
module attributes {stable_mosaic.version = 11 : i64} {
  func.func @_gcn_ff_kernel(%arg0: i32, %arg1: i32, %arg2: i32, %arg3: memref<1x128x128xbf16, #tpu.memory_space<vmem>>, %arg4: memref<1x128x128xbf16, #tpu.memory_space<vmem>>, %arg5: memref<128x128xf32, #tpu.memory_space<vmem>>, %arg6: memref<128x256xbf16, #tpu.memory_space<vmem>>, %arg7: memref<1x256xf32, #tpu.memory_space<vmem>>, %arg8: memref<256x128xbf16, #tpu.memory_space<vmem>>, %arg9: memref<1x128xf32, #tpu.memory_space<vmem>>, %arg10: memref<128x128xf32, #tpu.memory_space<vmem>>, %arg11: memref<128x128xf32, #tpu.memory_space<vmem>>) attributes {dimension_semantics = [#tpu.dimension_semantics<parallel>, #tpu.dimension_semantics<arbitrary>, #tpu.dimension_semantics<arbitrary>], iteration_bounds = array<i64: 2, 4, 2>, scalar_prefetch = 0 : i64, scratch_operands = 1 : i64, tpu.core_type = #tpu.core_type<tc>, window_params = [{transform_indices = @transform_0, window_bounds = array<i64: 1, 128, 128>}, {transform_indices = @transform_1, window_bounds = array<i64: 1, 128, 128>}, {transform_indices = @transform_2, window_bounds = array<i64: 128, 128>}, {pipeline_mode = #tpu.pipeline_mode<synchronous>, transform_indices = @transform_3, window_bounds = array<i64: 128, 256>}, {pipeline_mode = #tpu.pipeline_mode<synchronous>, transform_indices = @transform_4, window_bounds = array<i64: 1, 256>}, {pipeline_mode = #tpu.pipeline_mode<synchronous>, transform_indices = @transform_5, window_bounds = array<i64: 256, 128>}, {pipeline_mode = #tpu.pipeline_mode<synchronous>, transform_indices = @transform_6, window_bounds = array<i64: 1, 128>}, {transform_indices = @transform_7, window_bounds = array<i64: 128, 128>}]} {
    %c0_i32 = arith.constant 0 : i32
    %0 = arith.cmpi eq, %arg1, %c0_i32 : i32
    %c0_i32_0 = arith.constant 0 : i32
    %1 = arith.cmpi eq, %arg2, %c0_i32_0 : i32
    %2 = arith.andi %0, %1 : i1
    %3 = arith.extui %2 : i1 to i32
    %c0_i32_1 = arith.constant 0 : i32
    %4 = arith.cmpi ne, %3, %c0_i32_1 : i32
    scf.if %4 {
      %cst_12 = arith.constant 0.000000e+00 : f32
      %18 = vector.broadcast %cst_12 : f32 to vector<128x128xf32>
      %c0_13 = arith.constant 0 : index
      %c0_14 = arith.constant 0 : index
      %19 = vector.load %arg11[%c0_13, %c0_14] : memref<128x128xf32, #tpu.memory_space<vmem>>, vector<128x128xf32>
      tpu.vector_store %arg11[%c0_13, %c0_14], %18 {strides = array<i32>} : memref<128x128xf32, #tpu.memory_space<vmem>>, vector<128x128xf32>,
    } else {
    }
    %c0 = arith.constant 0 : index
    %c0_2 = arith.constant 0 : index
    %5 = vector.load %arg11[%c0, %c0_2] : memref<128x128xf32, #tpu.memory_space<vmem>>, vector<128x128xf32>
    %c0_3 = arith.constant 0 : index
    %c0_4 = arith.constant 0 : index
    %c0_5 = arith.constant 0 : index
    %6 = vector.load %arg3[%c0_3, %c0_4, %c0_5] : memref<1x128x128xbf16, #tpu.memory_space<vmem>>, vector<1x128x128xbf16>
    %7 = vector.shape_cast %6 : vector<1x128x128xbf16> to vector<128x128xbf16>
    %c0_6 = arith.constant 0 : index
    %c0_7 = arith.constant 0 : index
    %c0_8 = arith.constant 0 : index
    %8 = vector.load %arg4[%c0_6, %c0_7, %c0_8] : memref<1x128x128xbf16, #tpu.memory_space<vmem>>, vector<1x128x128xbf16>
    %9 = vector.shape_cast %8 : vector<1x128x128xbf16> to vector<128x128xbf16>
    %cst = arith.constant dense<0.000000e+00> : vector<128x128xf32>
    %10 = tpu.matmul %7, %9, %cst {dimension_numbers = #tpu.dot_dimension_numbers<[1], [0], [0], [1], [0, 0, 1, 1], [], []>} : vector<128x128xbf16>, vector<128x128xbf16>, vector<128x128xf32> -> vector<128x128xf32>
    %11 = arith.addf %5, %10 : vector<128x128xf32>
    %c0_9 = arith.constant 0 : index
    %c0_10 = arith.constant 0 : index
    %12 = vector.load %arg11[%c0_9, %c0_10] : memref<128x128xf32, #tpu.memory_space<vmem>>, vector<128x128xf32>
    tpu.vector_store %arg11[%c0_9, %c0_10], %11 {strides = array<i32>} : memref<128x128xf32, #tpu.memory_space<vmem>>, vector<128x128xf32>,
    %c3_i32 = arith.constant 3 : i32
    %13 = arith.cmpi eq, %arg1, %c3_i32 : i32
    %c1_i32 = arith.constant 1 : i32
    %14 = arith.cmpi eq, %arg2, %c1_i32 : i32
    %15 = arith.andi %13, %14 : i1
    %16 = arith.extui %15 : i1 to i32
    %c0_i32_11 = arith.constant 0 : i32
    %17 = arith.cmpi ne, %16, %c0_i32_11 : i32
    scf.if %17 {
      %c0_12 = arith.constant 0 : index
      %c0_13 = arith.constant 0 : index
      %18 = vector.load %arg5[%c0_12, %c0_13] : memref<128x128xf32, #tpu.memory_space<vmem>>, vector<128x128xf32>
      %c0_14 = arith.constant 0 : index
      %c0_15 = arith.constant 0 : index
      %19 = vector.load %arg11[%c0_14, %c0_15] : memref<128x128xf32, #tpu.memory_space<vmem>>, vector<128x128xf32>
      %20 = arith.addf %18, %19 : vector<128x128xf32>
      %21 = arith.truncf %20 : vector<128x128xf32> to vector<128x128xbf16>
      %c0_16 = arith.constant 0 : index
      %c0_17 = arith.constant 0 : index
      %22 = vector.load %arg6[%c0_16, %c0_17] : memref<128x256xbf16, #tpu.memory_space<vmem>>, vector<128x256xbf16>
      %cst_18 = arith.constant dense<0.000000e+00> : vector<128x256xf32>
      %23 = tpu.matmul %21, %22, %cst_18 {dimension_numbers = #tpu.dot_dimension_numbers<[1], [0], [0], [1], [0, 0, 1, 1], [], []>} : vector<128x128xbf16>, vector<128x256xbf16>, vector<128x256xf32> -> vector<128x256xf32>
      %c0_19 = arith.constant 0 : index
      %c0_20 = arith.constant 0 : index
      %24 = vector.load %arg7[%c0_19, %c0_20] : memref<1x256xf32, #tpu.memory_space<vmem>>, vector<1x256xf32>
      %25 = vector.broadcast %24 : vector<1x256xf32> to vector<128x256xf32>
      %26 = arith.addf %23, %25 : vector<128x256xf32>
      %cst_21 = arith.constant 0.000000e+00 : f32
      %27 = vector.broadcast %cst_21 : f32 to vector<128x256xf32>
      %28 = arith.cmpf oge, %26, %27 : vector<128x256xf32>
      %cst_22 = arith.constant 0.00999999977 : f32
      %29 = vector.broadcast %cst_22 : f32 to vector<128x256xf32>
      %30 = arith.mulf %29, %26 : vector<128x256xf32>
      %31 = arith.select %28, %26, %30 : vector<128x256xi1>, vector<128x256xf32>
      %32 = arith.truncf %31 : vector<128x256xf32> to vector<128x256xbf16>
      %c0_23 = arith.constant 0 : index
      %c0_24 = arith.constant 0 : index
      %33 = vector.load %arg8[%c0_23, %c0_24] : memref<256x128xbf16, #tpu.memory_space<vmem>>, vector<256x128xbf16>
      %cst_25 = arith.constant dense<0.000000e+00> : vector<128x128xf32>
      %34 = tpu.matmul %32, %33, %cst_25 {dimension_numbers = #tpu.dot_dimension_numbers<[1], [0], [0], [1], [0, 0, 1, 1], [], []>} : vector<128x256xbf16>, vector<256x128xbf16>, vector<128x128xf32> -> vector<128x128xf32>
      %c0_26 = arith.constant 0 : index
      %c0_27 = arith.constant 0 : index
      %35 = vector.load %arg9[%c0_26, %c0_27] : memref<1x128xf32, #tpu.memory_space<vmem>>, vector<1x128xf32>
      %36 = vector.broadcast %35 : vector<1x128xf32> to vector<128x128xf32>
      %37 = arith.addf %34, %36 : vector<128x128xf32>
      %38 = arith.addf %20, %37 : vector<128x128xf32>
      %c0_28 = arith.constant 0 : index
      %c0_29 = arith.constant 0 : index
      %39 = vector.load %arg10[%c0_28, %c0_29] : memref<128x128xf32, #tpu.memory_space<vmem>>, vector<128x128xf32>
      tpu.vector_store %arg10[%c0_28, %c0_29], %38 {strides = array<i32>} : memref<128x128xf32, #tpu.memory_space<vmem>>, vector<128x128xf32>,
    } else {
    }
    return
  }
  func.func @transform_0(%arg0: i32, %arg1: i32, %arg2: i32) -> (i32, i32, i32) {
    %c0_i32 = arith.constant 0 : i32
    return %arg1, %arg0, %arg2 : i32, i32, i32
  }
  func.func @transform_1(%arg0: i32, %arg1: i32, %arg2: i32) -> (i32, i32, i32) {
    %c0_i32 = arith.constant 0 : i32
    %c0_i32_0 = arith.constant 0 : i32
    return %arg1, %arg2, %c0_i32 : i32, i32, i32
  }
  func.func @transform_2(%arg0: i32, %arg1: i32, %arg2: i32) -> (i32, i32) {
    %c0_i32 = arith.constant 0 : i32
    %c0_i32_0 = arith.constant 0 : i32
    return %arg0, %c0_i32 : i32, i32
  }
  func.func @transform_3(%arg0: i32, %arg1: i32, %arg2: i32) -> (i32, i32) {
    %c0_i32 = arith.constant 0 : i32
    %c0_i32_0 = arith.constant 0 : i32
    %c0_i32_1 = arith.constant 0 : i32
    return %c0_i32, %c0_i32_0 : i32, i32
  }
  func.func @transform_4(%arg0: i32, %arg1: i32, %arg2: i32) -> (i32, i32) {
    %c0_i32 = arith.constant 0 : i32
    %c0_i32_0 = arith.constant 0 : i32
    %c0_i32_1 = arith.constant 0 : i32
    return %c0_i32, %c0_i32_0 : i32, i32
  }
  func.func @transform_5(%arg0: i32, %arg1: i32, %arg2: i32) -> (i32, i32) {
    %c0_i32 = arith.constant 0 : i32
    %c0_i32_0 = arith.constant 0 : i32
    %c0_i32_1 = arith.constant 0 : i32
    return %c0_i32, %c0_i32_0 : i32, i32
  }
  func.func @transform_6(%arg0: i32, %arg1: i32, %arg2: i32) -> (i32, i32) {
    %c0_i32 = arith.constant 0 : i32
    %c0_i32_0 = arith.constant 0 : i32
    %c0_i32_1 = arith.constant 0 : i32
    return %c0_i32, %c0_i32_0 : i32, i32
  }
  func.func @transform_7(%arg0: i32, %arg1: i32, %arg2: i32) -> (i32, i32) {
    %c0_i32 = arith.constant 0 : i32
    %c0_i32_0 = arith.constant 0 : i32
    return %arg0, %c0_i32 : i32, i32
  }
}

module attributes {stable_mosaic.version = 11 : i64} {
  func.func @_ln_xw_kernel(%arg0: i32, %arg1: memref<128x128xf32, #tpu.memory_space<vmem>>, %arg2: memref<1x128xf32, #tpu.memory_space<vmem>>, %arg3: memref<1x128xf32, #tpu.memory_space<vmem>>, %arg4: memref<128x512xbf16, #tpu.memory_space<vmem>>, %arg5: memref<128x128xf32, #tpu.memory_space<vmem>>, %arg6: memref<4x128x128xbf16, #tpu.memory_space<vmem>>) attributes {dimension_semantics = [#tpu.dimension_semantics<parallel>], iteration_bounds = array<i64: 2>, scalar_prefetch = 0 : i64, scratch_operands = 0 : i64, tpu.core_type = #tpu.core_type<tc>, window_params = [{transform_indices = @transform_0, window_bounds = array<i64: 128, 128>}, {pipeline_mode = #tpu.pipeline_mode<synchronous>, transform_indices = @transform_1, window_bounds = array<i64: 1, 128>}, {pipeline_mode = #tpu.pipeline_mode<synchronous>, transform_indices = @transform_2, window_bounds = array<i64: 1, 128>}, {pipeline_mode = #tpu.pipeline_mode<synchronous>, transform_indices = @transform_3, window_bounds = array<i64: 128, 512>}, {transform_indices = @transform_4, window_bounds = array<i64: 128, 128>}, {transform_indices = @transform_5, window_bounds = array<i64: 4, 128, 128>}]} {
    %c0 = arith.constant 0 : index
    %c0_0 = arith.constant 0 : index
    %0 = vector.load %arg1[%c0, %c0_0] : memref<128x128xf32, #tpu.memory_space<vmem>>, vector<128x128xf32>
    %cst = arith.constant dense<0.000000e+00> : vector<128xf32>
    %1 = vector.multi_reduction <add>, %0, %cst [1] : vector<128x128xf32> to vector<128xf32>
    %2 = vector.shape_cast %1 : vector<128xf32> to vector<128x1xf32>
    %cst_1 = arith.constant 1.280000e+02 : f32
    %3 = vector.broadcast %cst_1 : f32 to vector<128x1xf32>
    %4 = arith.divf %2, %3 : vector<128x1xf32>
    %5 = vector.broadcast %4 : vector<128x1xf32> to vector<128x128xf32>
    %6 = arith.subf %0, %5 : vector<128x128xf32>
    %7 = arith.mulf %6, %6 : vector<128x128xf32>
    %cst_2 = arith.constant dense<0.000000e+00> : vector<128xf32>
    %8 = vector.multi_reduction <add>, %7, %cst_2 [1] : vector<128x128xf32> to vector<128xf32>
    %9 = vector.shape_cast %8 : vector<128xf32> to vector<128x1xf32>
    %cst_3 = arith.constant 1.280000e+02 : f32
    %10 = vector.broadcast %cst_3 : f32 to vector<128x1xf32>
    %11 = arith.divf %9, %10 : vector<128x1xf32>
    %cst_4 = arith.constant 9.99999997E-7 : f32
    %12 = vector.broadcast %cst_4 : f32 to vector<128x1xf32>
    %13 = arith.addf %11, %12 : vector<128x1xf32>
    %14 = math.rsqrt %13 : vector<128x1xf32>
    %15 = vector.broadcast %14 : vector<128x1xf32> to vector<128x128xf32>
    %16 = arith.mulf %6, %15 : vector<128x128xf32>
    %c0_5 = arith.constant 0 : index
    %c0_6 = arith.constant 0 : index
    %17 = vector.load %arg2[%c0_5, %c0_6] : memref<1x128xf32, #tpu.memory_space<vmem>>, vector<1x128xf32>
    %18 = vector.broadcast %17 : vector<1x128xf32> to vector<128x128xf32>
    %19 = arith.mulf %16, %18 : vector<128x128xf32>
    %c0_7 = arith.constant 0 : index
    %c0_8 = arith.constant 0 : index
    %20 = vector.load %arg3[%c0_7, %c0_8] : memref<1x128xf32, #tpu.memory_space<vmem>>, vector<1x128xf32>
    %21 = vector.broadcast %20 : vector<1x128xf32> to vector<128x128xf32>
    %22 = arith.addf %19, %21 : vector<128x128xf32>
    %c0_9 = arith.constant 0 : index
    %c0_10 = arith.constant 0 : index
    %23 = vector.load %arg5[%c0_9, %c0_10] : memref<128x128xf32, #tpu.memory_space<vmem>>, vector<128x128xf32>
    tpu.vector_store %arg5[%c0_9, %c0_10], %22 {strides = array<i32>} : memref<128x128xf32, #tpu.memory_space<vmem>>, vector<128x128xf32>,
    %24 = arith.truncf %22 : vector<128x128xf32> to vector<128x128xbf16>
    %c0_11 = arith.constant 0 : index
    %c0_12 = arith.constant 0 : index
    %25 = vector.load %arg4[%c0_11, %c0_12] : memref<128x512xbf16, #tpu.memory_space<vmem>>, vector<128x512xbf16>
    %cst_13 = arith.constant dense<0.000000e+00> : vector<128x512xf32>
    %26 = tpu.matmul %24, %25, %cst_13 {dimension_numbers = #tpu.dot_dimension_numbers<[1], [0], [0], [1], [0, 0, 1, 1], [], []>} : vector<128x128xbf16>, vector<128x512xbf16>, vector<128x512xf32> -> vector<128x512xf32>
    %27 = vector.extract_strided_slice %26 {offsets = [0, 0], sizes = [128, 128], strides = [1, 1]} : vector<128x512xf32> to vector<128x128xf32>
    %28 = arith.truncf %27 : vector<128x128xf32> to vector<128x128xbf16>
    %c0_14 = arith.constant 0 : index
    %c0_15 = arith.constant 0 : index
    %c0_16 = arith.constant 0 : index
    %29 = vector.load %arg6[%c0_14, %c0_15, %c0_16] : memref<4x128x128xbf16, #tpu.memory_space<vmem>>, vector<1x128x128xbf16>
    %30 = vector.shape_cast %29 : vector<1x128x128xbf16> to vector<128x128xbf16>
    %31 = vector.shape_cast %28 : vector<128x128xbf16> to vector<1x128x128xbf16>
    tpu.vector_store %arg6[%c0_14, %c0_15, %c0_16], %31 {strides = array<i32>} : memref<4x128x128xbf16, #tpu.memory_space<vmem>>, vector<1x128x128xbf16>,
    %32 = vector.extract_strided_slice %26 {offsets = [0, 128], sizes = [128, 128], strides = [1, 1]} : vector<128x512xf32> to vector<128x128xf32>
    %33 = arith.truncf %32 : vector<128x128xf32> to vector<128x128xbf16>
    %c1 = arith.constant 1 : index
    %c0_17 = arith.constant 0 : index
    %c0_18 = arith.constant 0 : index
    %34 = vector.load %arg6[%c1, %c0_17, %c0_18] : memref<4x128x128xbf16, #tpu.memory_space<vmem>>, vector<1x128x128xbf16>
    %35 = vector.shape_cast %34 : vector<1x128x128xbf16> to vector<128x128xbf16>
    %36 = vector.shape_cast %33 : vector<128x128xbf16> to vector<1x128x128xbf16>
    tpu.vector_store %arg6[%c1, %c0_17, %c0_18], %36 {strides = array<i32>} : memref<4x128x128xbf16, #tpu.memory_space<vmem>>, vector<1x128x128xbf16>,
    %37 = vector.extract_strided_slice %26 {offsets = [0, 256], sizes = [128, 128], strides = [1, 1]} : vector<128x512xf32> to vector<128x128xf32>
    %38 = arith.truncf %37 : vector<128x128xf32> to vector<128x128xbf16>
    %c2 = arith.constant 2 : index
    %c0_19 = arith.constant 0 : index
    %c0_20 = arith.constant 0 : index
    %39 = vector.load %arg6[%c2, %c0_19, %c0_20] : memref<4x128x128xbf16, #tpu.memory_space<vmem>>, vector<1x128x128xbf16>
    %40 = vector.shape_cast %39 : vector<1x128x128xbf16> to vector<128x128xbf16>
    %41 = vector.shape_cast %38 : vector<128x128xbf16> to vector<1x128x128xbf16>
    tpu.vector_store %arg6[%c2, %c0_19, %c0_20], %41 {strides = array<i32>} : memref<4x128x128xbf16, #tpu.memory_space<vmem>>, vector<1x128x128xbf16>,
    %42 = vector.extract_strided_slice %26 {offsets = [0, 384], sizes = [128, 128], strides = [1, 1]} : vector<128x512xf32> to vector<128x128xf32>
    %43 = arith.truncf %42 : vector<128x128xf32> to vector<128x128xbf16>
    %c3 = arith.constant 3 : index
    %c0_21 = arith.constant 0 : index
    %c0_22 = arith.constant 0 : index
    %44 = vector.load %arg6[%c3, %c0_21, %c0_22] : memref<4x128x128xbf16, #tpu.memory_space<vmem>>, vector<1x128x128xbf16>
    %45 = vector.shape_cast %44 : vector<1x128x128xbf16> to vector<128x128xbf16>
    %46 = vector.shape_cast %43 : vector<128x128xbf16> to vector<1x128x128xbf16>
    tpu.vector_store %arg6[%c3, %c0_21, %c0_22], %46 {strides = array<i32>} : memref<4x128x128xbf16, #tpu.memory_space<vmem>>, vector<1x128x128xbf16>,
    return
  }
  func.func @transform_0(%arg0: i32) -> (i32, i32) {
    %c0_i32 = arith.constant 0 : i32
    %c0_i32_0 = arith.constant 0 : i32
    return %arg0, %c0_i32 : i32, i32
  }
  func.func @transform_1(%arg0: i32) -> (i32, i32) {
    %c0_i32 = arith.constant 0 : i32
    %c0_i32_0 = arith.constant 0 : i32
    %c0_i32_1 = arith.constant 0 : i32
    return %c0_i32, %c0_i32_0 : i32, i32
  }
  func.func @transform_2(%arg0: i32) -> (i32, i32) {
    %c0_i32 = arith.constant 0 : i32
    %c0_i32_0 = arith.constant 0 : i32
    %c0_i32_1 = arith.constant 0 : i32
    return %c0_i32, %c0_i32_0 : i32, i32
  }
  func.func @transform_3(%arg0: i32) -> (i32, i32) {
    %c0_i32 = arith.constant 0 : i32
    %c0_i32_0 = arith.constant 0 : i32
    %c0_i32_1 = arith.constant 0 : i32
    return %c0_i32, %c0_i32_0 : i32, i32
  }
  func.func @transform_4(%arg0: i32) -> (i32, i32) {
    %c0_i32 = arith.constant 0 : i32
    %c0_i32_0 = arith.constant 0 : i32
    return %arg0, %c0_i32 : i32, i32
  }
  func.func @transform_5(%arg0: i32) -> (i32, i32, i32) {
    %c0_i32 = arith.constant 0 : i32
    %c0_i32_0 = arith.constant 0 : i32
    %c0_i32_1 = arith.constant 0 : i32
    return %c0_i32, %arg0, %c0_i32_0 : i32, i32, i32
  }
}

</mosaic_0001>

<bundles_post_ra>
// kernel: encoder_layer_forward.3
= control target key start
LH: loop header
LB: loop body
LE: loop exit
PB: predicated region body
PF: predicated region fallthrough
CT: control target
= control target key end

     0   :  { %s2641_s0 = inlined_call_operand.hbm [shape: bf16[4,256,256], index: 0, kind: input, shape index: {}]   ;;  %s2642_s1 = inlined_call_operand.vmem [shape: bf16[4,256,128], index: 1, kind: input, shape index: {}]   ;;  %s2643_s2 = inlined_call_operand.vmem [shape: f32[256,128], index: 2, kind: input, shape index: {}]   ;;  %s2644_s3 = inlined_call_operand.vmem [shape: bf16[128,256], index: 3, kind: input, shape index: {}]   ;;  %s2645_s4 = inlined_call_operand.vmem [shape: f32[1,256], index: 4, kind: input, shape index: {}]   ;;  %s2646_s5 = inlined_call_operand.vmem [shape: bf16[256,128], index: 5, kind: input, shape index: {}]   ;;  %s2647_s6 = inlined_call_operand.vmem [shape: f32[1,128], index: 6, kind: input, shape index: {}]   ;;  %s2648_s7 = inlined_call_operand.hbm [shape: f32[256,128], index: 7, kind: output, shape index: {}]  }
   0x1   :  { %2661 = sst [smem:[#allocation15_spill]] %s2643_s2 }
   0x2   :  { %2662 = sst [smem:[#allocation16_spill]] %s2644_s3 }
   0x3   :  { %2663 = sst [smem:[#allocation17_spill]] %s2645_s4 }
   0x4   :  { %2664 = sst [smem:[#allocation18_spill]] %s2646_s5 }
   0x5   :  { %2665 = sst [smem:[#allocation19_spill]] %s2647_s6 }
   0x6   :  { %2666 = sst [smem:[#allocation20_spill]] %s2648_s7 }
   0x7   :  { %12 = vsyncpa [#allocation4], 0 }
   0x8   :  { %14 = vsyncpa [#allocation4 + $0x1], 0 }
   0x9   :  { %15 = vsyncpa [#allocation5], 0 }
   0xa   :  { %17 = vsyncpa [#allocation5 + $0x1], 0  ;;  %s2078_s24 = smov 0   ;;  %s2080_s25 = smov 0  }
   0xb   :  { %s2082_s26 = smov 0   ;;  %s2084_s27 = smov 0  }
   0xc   :  { %s2086_s28 = smov 0   ;;  %s2088_s29 = smov 0  }
   0xd   :  { %s2090_s30 = smov 0   ;;  %s2092_s8 = smov 0  }
   0xe   :  { %s2094_s9 = smov 0   ;;  %s2096_s10 = smov 0  }
   0xf   :  { %s2098_s11 = smov 0   ;;  %s2100_s12 = smov 0  }
  0x10   :  { %s2102_s13 = smov 0  }
  0x11 LB: > { %2667 = sst [smem:[#allocation9_spill]] %s1979_s24  ;;  %s1477_s14 = sadd.s32 4294967295, %s2027_s13   ;;  %s2027_s13 = sphi %s2102_s13, %s23_s13   ;;  %s2023_s12 = sphi %s2100_s12, %s2709_s12   ;;  %s2019_s11 = sphi %s2098_s11, %s2708_s11   ;;  %s2015_s10 = sphi %s2096_s10, %s2707_s10   ;;  %s2011_s9 = sphi %s2094_s9, %s2706_s9   ;;  %s2007_s8 = sphi %s2092_s8, %s2705_s8   ;;  %s2003_s30 = sphi %s2090_s30, %s2704_s30   ;;  %s1999_s29 = sphi %s2088_s29, %s2703_s29   ;;  %s1995_s28 = sphi %s2086_s28, %s2702_s28   ;;  %s1991_s27 = sphi %s2084_s27, %s2701_s27   ;;  %s1987_s26 = sphi %s2082_s26, %s2700_s26   ;;  %s1983_s25 = sphi %s2080_s25, %s2699_s25   ;;  %s1979_s24 = sphi %s2078_s24, %s2698_s24  }
  0x12   : > { %s1478_s15 = sadd.s32 4294967294, %s2027_s13   ;;  %s35_s16 = sadd.s32 1, %s2015_s10 }
  0x13   : > { %s38_s17 = sadd.s32 1, %s2019_s11  ;;  %p36_p0 = scmp.ge.s32.totalorder %s35_s16, 2 }
  0x14   : > { %s42_s18 = sadd.s32 1, %s2023_s12  ;;  %p60_p1 = scmp.ne.s32.totalorder %s1999_s29, %s1995_s28 }
  0x15   : > { %s2711_s16 = smov (%p36_p0, %s35_s16), 0  ;;  %s2713_s17 = smov (!%p36_p0, %s38_s17), %s2019_s11 }
  0x16   : > { %2668 = sst [smem:[#allocation10_spill]] %s2711_s16  ;;  %s49_s20 = ssub.s32 %s2015_s10, %s2711_s16 }
  0x17   : > { %p61_p2 = scmp.eq.s32.totalorder %s2027_s13, 0  ;;  %p40_p3 = scmp.ge.s32.totalorder %s2713_s17, 4 }
  0x18   : > { %p66_p4 = scmp.ne.s32.totalorder %s1995_s28, %s1991_s27  ;;  %p67_p6 = scmp.eq.s32.totalorder %s1477_s14, 0 }
  0x19   : > { %p2159_p5 = por %p61_p2, %p60_p1  ;;  %s2715_s17 = smov (%p40_p3, %s2713_s17), 0 }
  0x1a   : > { %2670 = sst [smem:[#allocation11_spill]] %s2715_s17  ;;  %s2717_s18 = smov (!%p40_p3, %s42_s18), %s2023_s12 }
  0x1b   : > { %s46_s22 = ssub.s32 %s2019_s11, %s2715_s17  ;;  %p2168_p7 = por %p67_p6, %p66_p4 }
  0x1c   : > { %p44_p8 = scmp.ge.s32.totalorder %s2717_s18, 2  ;;  %s217_s27 = sadd.s32 1, %s1987_s26 }
  0x1d   : > { %p227_p9 = scmp.ne.s32.totalorder %s1987_s26, %s1983_s25  ;;  %p228_p10 = scmp.eq.s32.totalorder %s1477_s14, 15 }
  0x1e   : > { %s2719_s18 = smov (%p44_p8, %s2717_s18), 0  ;;  %p233_p12 = scmp.ne.s32.totalorder %s1983_s25, %s1979_s24 }
  0x1f   : > { %2672 = sst [smem:[#allocation12_spill]] %s2719_s18  ;;  %p2177_p11 = por %p228_p10, %p227_p9 }
  0x20   : > { %s47_s17 = ssub.s32 %s2023_s12, %s2719_s18  ;;  %p234_p13 = scmp.eq.s32.totalorder %s1478_s15, 15 }
  0x21   : > { %s2673_s19 = scalar_select %p2177_p11, 1, 0 }
  0x22   : > { %s48_s16 = sor.u32 %s47_s17, %s46_s22  ;;  %p215_p0 = scmp.eq.s32.totalorder %s47_s17, 0 }
  0x23   : > { %2674 = sst [smem:[#allocation13_spill]] %s2673_s19  ;;  %s50_s7 = sor.u32 %s49_s20, %s48_s16 }
  0x24   : > { %p2185_p1 = por %p234_p13, %p233_p12  ;;  %p51_p2 = scmp.eq.s32.totalorder %s50_s7, 0 }
  0x25   : > { %s2190_s14 = scalar_select %p215_p0, %s1987_s26, %s217_s27  }
  0x26   : > { %s2675_s6 = scalar_select %p2185_p1, 1, 0 }
  0x27   : > { %s2677_s4 = sadd.s32 1, %s1999_s29  ;;  %p1690_p3 = scmp.lt.s32.totalorder %s2027_s13, 16 }
  0x28   : > { %2676 = sst [smem:[#allocation14_spill]] %s2675_s6  ;;  %s266_s19 = sand.u32 1, %s1999_s29  }
  0x29   : > { %s2195_s5 = scalar_select %p51_p2, %s1999_s29, %s2677_s4  }
  0x2a   : > { %s1481_s3 = sshll.u32 %s266_s19, 6  ;;  %s1548_s24 = sshll.u32 %s2023_s12, 5 }
  0x2b   : > { %s276_s18 = sadd.s32 %s2015_s10, %s1548_s24  ;;  %s1484_s15 = sshll.u32 %s2019_s11, 6 }
  0x2c   : > { %s278_s22 = sadd.s32 %s1484_s15, %s276_s18  ;;  %s270_s17 = scalar_lea.vmem [#allocation3], %s1481_s3 }
  0x2d   : > { %s281_s16 = sshll.u32 %s270_s17, 4  ;;  %s1485_s20 = sshll.u32 %s278_s22, 6  ;;  %s2202_s16 = int_to_ptr.vmem [resolvable:$true] %s281_s16 }
  0x2e   : > { %s2207_s7 = scalar_lea.hbm %s2641_s0, %s1485_s20  ;;  %p2211_p4 = pnand %p1690_p3, %p2159_p5 }
  0x2f   : > { %s2215_s3 = scalar_lea.sflag [#allocation4], %s266_s19  ;;  %s1859_s24 = scalar_lea.hbm %s2207_s7, 1024 }
  0x30   : > { %p1860_p6 = scmp.ne.s32.totalorder %s2207_s7, %s1859_s24  ;;  %p1861_p8 = pneg %p2211_p4 }
  0x31   : > { %s1864_s18 = scalar_lea.hbm %s2641_s0, 16384  ;;  %p1865_p5 = scmp.lt.u32.totalorder %s2207_s7, %s2641_s0 }
  0x32   : > { %p1862_p9 = pnand %p1861_p8, %p1860_p6  ;;  %p1866_p12 = scmp.lt.u32.totalorder %s1864_s18, %s1859_s24 }
  0x33   : > { %p1868_p0 = scmp.lt.u32.totalorder %s1859_s24, %s2207_s7 }
  0x34   : > { %p1863_p10 = pneg %p1862_p9  ;;  %p1867_p13 = por %p1866_p12, %p1865_p5 }
  0x36   : > { %p1869_p2 = por %p1868_p0, %p1867_p13 }
  0x38   : > { %p1870_p3 = pnand %p1869_p2, %p1863_p10 }
  0x3a   : > { %1873 = shalt.err (!%p1870_p3)
}
  0x3b   : > { %s1874_s19 = scalar_lea.vmem %s2202_s16, 1024  ;;  %s2029_s15 = smov [#allocation3]  }
  0x3c   : > { %p1875_p6 = scmp.ne.s32.totalorder %s2202_s16, %s1874_s19  ;;  %s1879_s22 = sshll.u32 %s2029_s15, 4  ;;  %s1880_s22 = int_to_ptr.vmem [resolvable:$false] %s1879_s22 }
  0x3d   : > { %s1881_s17 = scalar_lea.vmem %s1880_s22, 2048  ;;  %p1882_p11 = scmp.lt.s32.totalorder %s2202_s16, %s1880_s22 }
  0x3e   : > { %p1877_p9 = pnand %p1875_p6, %p1861_p8  ;;  %p1883_p5 = scmp.lt.s32.totalorder %s1881_s17, %s1874_s19 }
  0x40   : > { %p1878_p1 = pneg %p1877_p9  ;;  %p1884_p12 = por %p1883_p5, %p1882_p11 }
  0x42   : > { %p1885_p13 = pnand %p1884_p12, %p1878_p1 }
  0x44   : > { %1888 = shalt.err (!%p1885_p13)
}
  0x45   : > { %s2030_s20 = smov 128   ;;  %s2031_s24 = smov 64  }
  0x46   : > { %s2032_s2 = smov 4   ;;  %p1486_p8 = scmp.ge.s32.totalorder %s2027_s13, 1 }
  0x47   : > { %1685 = dma.hbm_to_vmem [thread:$0]  (!%p2211_p4), %s2207_s7, 1024, %s2202_s16, %s2215_s3, %s2030_s20, %s2031_s24, %s2032_s2  }
  0x48   : > { %p311_p10 = scmp.lt.s32.totalorder %s2027_s13, 17 }
  0x4a   : > { %p312_p0 = pnand %p1486_p8, %p311_p10 }
  0x4b   : > { %s317_s6 = sand.u32 (!%p312_p0), 1, %s1995_s28  }
  0x4c   : > { %315 = sbr.rel (%p312_p0) target bundleno = 894 (0x37e), region = 48  ;;  %s1487_s18 = sshll.u32 (!%p312_p0), %s317_s6, 6 }
  0x4d   : > { %s318_s21 = scalar_lea.sflag (!%p312_p0), [#allocation4], %s317_s6  ;;  %s2246_s27 = scalar_lea.vmem (!%p312_p0), [#allocation3], %s1487_s18 }
  0x53   : > { %1970 = dma.done.wait (%p2168_p7), %s318_s21, 1024  }
  0x54   : > { %1972 = vsyncadd (%p2168_p7), %s318_s21, 4294966272  ;;  %s2660_s16 = sand.u32 1, %s1983_s25   ;;  %s1489_s7 = sshll.u32 %s2003_s30, 4 }
  0x55   : > { %s1488_s4 = sshll.u32 %s2660_s16, 7  ;;  %p368_p11 = scmp.lt.s32.totalorder %s2007_s8, 3 }
  0x56   : > { %p370_p1 = scmp.lt.s32.totalorder %s1489_s7, 31  ;;  %s1492_s15 = sshll.u32 %s2011_s9, 4 }
  0x57   : > { %s369_s3 = scalar_select %p368_p11, %s2007_s8, 3 }
  0x58   : > { %s2721_s7 = smov (!%p370_p1, %s1489_s7), 31  ;;  %p378_p7 = scmp.lt.s32.totalorder %s1492_s15, 31 }
  0x59   : > { %s1490_s19 = sshll.u32 %s369_s3, 5  ;;  %p385_p4 = scmp.eq.s32.totalorder %s2007_s8, 0 }
  0x5a   : > { %s373_s23 = sadd.s32 %s1490_s19, %s2721_s7  ;;  %p386_p2 = scmp.eq.s32.totalorder %s2003_s30, 0 }
  0x5b   : > { %s1491_s22 = sshll.u32 %s373_s23, 2  ;;  %s2723_s15 = smov (!%p378_p7, %s1492_s15), 31 }
  0x5c   : > { %s2263_s24 = scalar_lea.vmem %s2642_s1, %s1491_s22  ;;  %p387_p3 = pnand %p386_p2, %p385_p4 }
  0x5d   : > { %s1493_s2 = sshll.u32 %s2723_s15, 3  ;;  %s2679_s21 = sld [smem:[#allocation15_spill]]  ;;  %v2033_v0 = vmov (!%p387_p3), 0.0  }
  0x5e   : > { %s2271_s3 = scalar_lea.vmem [#allocation6], %s1488_s4  ;;  %390 = sbr.rel (%p387_p3) target bundleno = 102 (0x66), region = 56  ;;  %391 = vst [vmem:[#allocation2] sm:$0xff] (!%p387_p3), %v2033_v0  ;;  %392 = vst [vmem:[#allocation2 + $0x8] sm:$0xff] (!%p387_p3), %v2033_v0 }
  0x5f   : > { %393 = vst [vmem:[#allocation2 + $0x10] sm:$0xff] (!%p387_p3), %v2033_v0  ;;  %394 = vst [vmem:[#allocation2 + $0x18] sm:$0xff] (!%p387_p3), %v2033_v0 }
  0x60   : > { %395 = vst [vmem:[#allocation2 + $0x20] sm:$0xff] (!%p387_p3), %v2033_v0  ;;  %396 = vst [vmem:[#allocation2 + $0x28] sm:$0xff] (!%p387_p3), %v2033_v0 }
  0x61   : > { %397 = vst [vmem:[#allocation2 + $0x30] sm:$0xff] (!%p387_p3), %v2033_v0  ;;  %398 = vst [vmem:[#allocation2 + $0x38] sm:$0xff] (!%p387_p3), %v2033_v0 }
  0x62   : > { %399 = vst [vmem:[#allocation2 + $0x40] sm:$0xff] (!%p387_p3), %v2033_v0  ;;  %400 = vst [vmem:[#allocation2 + $0x48] sm:$0xff] (!%p387_p3), %v2033_v0 }
  0x63   : > { %s2269_s16 = scalar_lea.vmem %s2679_s21, %s1493_s2  ;;  %401 = vst [vmem:[#allocation2 + $0x50] sm:$0xff] (!%p387_p3), %v2033_v0  ;;  %402 = vst [vmem:[#allocation2 + $0x58] sm:$0xff] (!%p387_p3), %v2033_v0 }
  0x64   : > { %403 = vst [vmem:[#allocation2 + $0x60] sm:$0xff] (!%p387_p3), %v2033_v0  ;;  %404 = vst [vmem:[#allocation2 + $0x68] sm:$0xff] (!%p387_p3), %v2033_v0 }
  0x65   : > { %405 = vst [vmem:[#allocation2 + $0x70] sm:$0xff] %v2033_v0  ;;  %406 = vst [vmem:[#allocation2 + $0x78] sm:$0xff] %v2033_v0 }
  0x66 PF: > { %v1803_v1 = vld [vmem:[%s2263_s24] sm:$0xff]   ;;  %v1804_v2 = vld [vmem:[%s2263_s24 + $0x8] sm:$0xff]   ;;  %v1805_v3 = vld [vmem:[%s2263_s24 + $0x10] sm:$0xff]   ;;  %p680_p6 = scmp.eq.s32.totalorder %s2007_s8, 3  ;;  %p681_p9 = scmp.eq.s32.totalorder %s2003_s30, 1 }
  0x67   : > { %1630 = vmatprep.subr.bf16.mxu0 %v1803_v1  ;;  %1662 = vmatprep.subr.bf16.mxu1 %v1803_v1  ;;  %v1806_v4 = vld [vmem:[%s2263_s24 + $0x18] sm:$0xff]   ;;  %v1811_v5 = vld [vmem:[%s2246_s27] sm:$0xff]   ;;  %v1808_v8 = vld [vmem:[%s2263_s24 + $0x28] sm:$0xff]  }
  0x68   : > { %1631 = vmatpush3.bf16.msra.mxu0 %v1803_v1  ;;  %1670 = vmatpush3.bf16.msra.mxu1 %v1803_v1  ;;  %v1812_v6 = vld [vmem:[%s2246_s27 + $0x20] sm:$0xff]   ;;  %v1809_v9 = vld [vmem:[%s2263_s24 + $0x30] sm:$0xff]   ;;  %v1810_v10 = vld [vmem:[%s2263_s24 + $0x38] sm:$0xff]   ;;  %p2291_p5 = pnand %p681_p9, %p680_p6 }
  0x69   : > { %1632 = vmatprep.subr.bf16.mxu0 %v1804_v2  ;;  %1663 = vmatprep.subr.bf16.mxu1 %v1804_v2  ;;  %v1807_v7 = vld [vmem:[%s2263_s24 + $0x20] sm:$0xff]   ;;  %v1813_v11 = vld [vmem:[%s2246_s27 + $0x8] sm:$0xff]   ;;  %v1815_v13 = vld [vmem:[%s2246_s27 + $0x10] sm:$0xff]   ;;  %s2683_s19 = sld [smem:[#allocation18_spill]] (!%p2291_p5)  ;;  %s2684_s24 = sld [smem:[#allocation17_spill]] (!%p2291_p5) }
  0x6a   : > { %1646 = vmatprep.mubr.bf16.mxu0 %v1811_v5  ;;  %1654 = vmatprep.mubr.bf16.mxu1 %v1812_v6  ;;  %v1814_v12 = vld [vmem:[%s2246_s27 + $0x28] sm:$0xff]   ;;  %v1816_v14 = vld [vmem:[%s2246_s27 + $0x30] sm:$0xff]   ;;  %v1817_v15 = vld [vmem:[%s2246_s27 + $0x18] sm:$0xff]   ;;  %s2685_s18 = sld [smem:[#allocation19_spill]] (!%p2291_p5) }
  0x6b   : > { %v1818_v16 = vld [vmem:[%s2246_s27 + $0x38] sm:$0xff]   ;;  %v409_v17 = vld [vmem:[#allocation2 + $0x10] sm:$0xff]  ;;  %v407_v19 = vld [vmem:[#allocation2] sm:$0xff]  ;;  %s2681_s27 = sld [smem:[#allocation16_spill]] (!%p2291_p5) }
  0x6c   : > { %1633 = vmatpush3.bf16.msra.mxu0 %v1804_v2  ;;  %1671 = vmatpush3.bf16.msra.mxu1 %v1804_v2  ;;  %v417_v18 = vld [vmem:[#allocation2 + $0x50] sm:$0xff]  ;;  %v415_v20 = vld [vmem:[#allocation2 + $0x40] sm:$0xff]  ;;  %v410_v23 = vld [vmem:[#allocation2 + $0x18] sm:$0xff] }
  0x6d   : > { %1634 = vmatprep.subr.bf16.mxu0 %v1805_v3  ;;  %1664 = vmatprep.subr.bf16.mxu1 %v1805_v3  ;;  %v418_v24 = vld [vmem:[#allocation2 + $0x58] sm:$0xff]  ;;  %v408_v29 = vld [vmem:[#allocation2 + $0x8] sm:$0xff]  ;;  %v413_v41 = vld [vmem:[#allocation2 + $0x30] sm:$0xff] }
  0x6e   : > { %v416_v30 = vld [vmem:[#allocation2 + $0x48] sm:$0xff]  ;;  %v421_v42 = vld [vmem:[#allocation2 + $0x70] sm:$0xff]  ;;  %v411_v43 = vld [vmem:[#allocation2 + $0x20] sm:$0xff] }
  0x6f   : > { %v419_v44 = vld [vmem:[#allocation2 + $0x60] sm:$0xff]  ;;  %v414_v47 = vld [vmem:[#allocation2 + $0x38] sm:$0xff]  ;;  %v412_v53 = vld [vmem:[#allocation2 + $0x28] sm:$0xff] }
  0x70   : > { %1635 = vmatpush3.bf16.msra.mxu0 %v1805_v3  ;;  %1672 = vmatpush3.bf16.msra.mxu1 %v1805_v3  ;;  %v422_v48 = vld [vmem:[#allocation2 + $0x78] sm:$0xff]  ;;  %v420_v54 = vld [vmem:[#allocation2 + $0x68] sm:$0xff]  ;;  %v2034_v3 = vmov (!%p2291_p5), 0  }
  0x71   : > { %1636 = vmatprep.subr.bf16.mxu0 %v1806_v4  ;;  %1665 = vmatprep.subr.bf16.mxu1 %v1806_v4  ;;  %s2682_s4 = smov (!%p2291_p5), %s2681_s27  ;;  %v1819_v1 = vld [vmem:[%s2681_s27 + $0x4] ss:$8 sps:$4 sm:$0xff] (!%p2291_p5)  }
  0x72   : > { %v1821_v2 = vld [vmem:[%s2682_s4] ss:$8 sps:$4 sm:$0xff] (!%p2291_p5)   ;;  %v1824_v5 = vld [vmem:[%s2682_s4 + $0x10] ss:$8 sps:$4 sm:$0xff] (!%p2291_p5)   ;;  %v1825_v6 = vld [vmem:[%s2682_s4 + $0x24] ss:$8 sps:$4 sm:$0xff] (!%p2291_p5)  }
  0x74   : > { %1637 = vmatpush3.bf16.msra.mxu0 %v1806_v4  ;;  %1673 = vmatpush3.bf16.msra.mxu1 %v1806_v4  ;;  %v1822_v4 = vld [vmem:[%s2682_s4 + $0x14] ss:$8 sps:$4 sm:$0xff] (!%p2291_p5)  }
  0x75   : > { %1638 = vmatprep.subr.bf16.mxu0 %v1807_v7  ;;  %1666 = vmatprep.subr.bf16.mxu1 %v1807_v7 }
  0x78   : > { %1639 = vmatpush3.bf16.msra.mxu0 %v1807_v7  ;;  %1674 = vmatpush3.bf16.msra.mxu1 %v1807_v7  ;;  %v1827_v7 = vld [vmem:[%s2682_s4 + $0x20] ss:$8 sps:$4 sm:$0xff] (!%p2291_p5)  }
  0x79   : > { %1640 = vmatprep.subr.bf16.mxu0 %v1808_v8  ;;  %1667 = vmatprep.subr.bf16.mxu1 %v1808_v8 }
  0x7c   : > { %1641 = vmatpush3.bf16.msra.mxu0 %v1808_v8  ;;  %1675 = vmatpush3.bf16.msra.mxu1 %v1808_v8  ;;  %v1828_v8 = vld [vmem:[%s2682_s4 + $0x34] ss:$8 sps:$4 sm:$0xff] (!%p2291_p5)  }
  0x7d   : > { %1642 = vmatprep.subr.bf16.mxu0 %v1809_v9  ;;  %1668 = vmatprep.subr.bf16.mxu1 %v1809_v9 }
  0x80   : > { %1643 = vmatpush3.bf16.msra.mxu0 %v1809_v9  ;;  %1676 = vmatpush3.bf16.msra.mxu1 %v1809_v9  ;;  %v1830_v9 = vld [vmem:[%s2682_s4 + $0x30] ss:$8 sps:$4 sm:$0xff] (!%p2291_p5)  }
  0x81   : > { %1644 = vmatprep.subr.bf16.mxu0 %v1810_v10  ;;  %1669 = vmatprep.subr.bf16.mxu1 %v1810_v10 }
  0x84   : > { %1645 = vmatpush3.bf16.msra.mxu0 %v1810_v10  ;;  %1677 = vmatpush3.bf16.msra.mxu1 %v1810_v10  ;;  %v1831_v10 = vld [vmem:[%s2682_s4 + $0x44] ss:$8 sps:$4 sm:$0xff] (!%p2291_p5)  }
  0x85   : > { %850 = vmatprep.subr.bf16.mxu0 (!%p2291_p5), %v1819_v1 }
  0x87   : > { %1647 = vmatmul.mubr.bf16.vlgmr.msra.gmra.mrb[0].mxu0 %v1813_v11  ;;  %1655 = vmatmul.mubr.bf16.vlgmr.msra.gmra.mrb[0].mxu1 %v1814_v12  ;;  %v1833_v11 = vld [vmem:[%s2682_s4 + $0x40] ss:$8 sps:$4 sm:$0xff] (!%p2291_p5)   ;;  %v1834_v12 = vld [vmem:[%s2682_s4 + $0x54] ss:$8 sps:$4 sm:$0xff] (!%p2291_p5)  }
  0x88   : > { %1650 = vmatprep.mubr.bf16.mxu0 %v1815_v13  ;;  %1658 = vmatprep.mubr.bf16.mxu1 %v1816_v14  ;;  %v1836_v13 = vld [vmem:[%s2682_s4 + $0x50] ss:$8 sps:$4 sm:$0xff] (!%p2291_p5)   ;;  %v1837_v14 = vld [vmem:[%s2682_s4 + $0x64] ss:$8 sps:$4 sm:$0xff] (!%p2291_p5)  }
  0x89   : > { %851 = vmatpush1.bf16.msra.mxu0 (!%p2291_p5), %v1821_v2 }
  0x8a   : > { %852 = vmatprep.subr.bf16.mxu0 (!%p2291_p5), %v1822_v4 }
  0x8d   : > { %853 = vmatpush1.bf16.msra.mxu0 (!%p2291_p5), %v1824_v5 }
  0x8e   : > { %854 = vmatprep.subr.bf16.mxu0 (!%p2291_p5), %v1825_v6 }
  0x8f   : > { %1651 = vmatmul.mubr.bf16.gmra.mrb[4].mxu0 %v1817_v15  ;;  %1659 = vmatmul.mubr.bf16.gmra.mrb[4].mxu1 %v1818_v16  ;;  %v1839_v15 = vld [vmem:[%s2682_s4 + $0x60] ss:$8 sps:$4 sm:$0xff] (!%p2291_p5)  }
  0x90   : > { %882 = vmatprep.mubr.bf16.mxu0 (!%p2291_p5), %v2034_v3  ;;  %v686_v16 = vld [vmem:[%s2269_s16] sm:$0xff] (!%p2291_p5) }
  0x91   : > { %855 = vmatpush1.bf16.msra.mxu0 (!%p2291_p5), %v1827_v7  ;;  %v698_v7 = vld [vmem:[%s2269_s16 + $0x60] sm:$0xff] (!%p2291_p5) }
  0x92   : > { %856 = vmatprep.subr.bf16.mxu0 (!%p2291_p5), %v1828_v8  ;;  %v699_v8 = vld [vmem:[%s2269_s16 + $0x68] sm:$0xff] (!%p2291_p5) }
  0x95   : > { %857 = vmatpush1.bf16.msra.mxu0 (!%p2291_p5), %v1830_v9 }
  0x96   : > { %858 = vmatprep.subr.bf16.mxu0 (!%p2291_p5), %v1831_v10 }
  0x99   : > { %859 = vmatpush1.bf16.msra.mxu0 (!%p2291_p5), %v1833_v11 }
  0x9a   : > { %860 = vmatprep.subr.bf16.mxu0 (!%p2291_p5), %v1834_v12 }
  0x9d   : > { %861 = vmatpush1.bf16.msra.mxu0 (!%p2291_p5), %v1836_v13 }
  0x9e   : > { %862 = vmatprep.subr.bf16.mxu0 (!%p2291_p5), %v1837_v14  ;;  %v700_v14 = vld [vmem:[%s2269_s16 + $0x70] sm:$0xff] (!%p2291_p5) }
  0xa1   : > { %863 = vmatpush1.bf16.msra.mxu0 (!%p2291_p5), %v1839_v15  ;;  %v701_v15 = vld [vmem:[%s2269_s16 + $0x78] sm:$0xff] (!%p2291_p5) }
 0x15a   : > { %v1648_v21 = vpop.f32.mrb[0].mxu0  ;;  %v1656_v22 = vpop.f32.mrb[0].mxu1 }
 0x15b   : > { %v650_v25 = vadd.f32 %v1648_v21, %v409_v17  ;;  %v658_v26 = vadd.f32 %v1656_v22, %v417_v18  ;;  %v585_v27 = vpop.f32.mrb[1].mxu0  ;;  %v617_v28 = vpop.f32.mrb[1].mxu1  ;;  %v687_v17 = vld [vmem:[%s2269_s16 + $0x8] sm:$0xff] (!%p2291_p5)  ;;  %v1843_v21 = vld [vmem:[%s2683_s19 + $0x40] sm:$0xff] (!%p2291_p5)  }
 0x15c   : > { %v648_v31 = vadd.f32 %v585_v27, %v407_v19  ;;  %v656_v32 = vadd.f32 %v617_v28, %v415_v20  ;;  %v1649_v33 = vpop.f32.mrb[2].mxu0  ;;  %v1657_v34 = vpop.f32.mrb[2].mxu1  ;;  %v1840_v20 = vld [vmem:[%s2682_s4 + $0x74] ss:$8 sps:$4 sm:$0xff] (!%p2291_p5)   ;;  %v1844_v22 = vld [vmem:[%s2683_s19] sm:$0xff] (!%p2291_p5)   ;;  %1566 = vmatprep.subr.bf16.mxu1 (!%p2291_p5), %v1843_v21  ;;  %v1853_v21 = vld [vmem:[%s2683_s19 + $0x68] sm:$0xff] (!%p2291_p5)  }
 0x15d   : > { %666 = vst [vmem:[#allocation2 + $0x10] sm:$0xff] %v650_v25  ;;  %674 = vst [vmem:[#allocation2 + $0x50] sm:$0xff] %v658_v26  ;;  %v651_v35 = vadd.f32 %v1649_v33, %v410_v23  ;;  %v659_v36 = vadd.f32 %v1657_v34, %v418_v24  ;;  %v588_v37 = vpop.f32.mrb[3].mxu0  ;;  %v620_v38 = vpop.f32.mrb[3].mxu1  ;;  %v1845_v23 = vld [vmem:[%s2683_s19 + $0x48] sm:$0xff] (!%p2291_p5)   ;;  %1567 = vmatpush3.bf16.msra.mxu1 (!%p2291_p5), %v1844_v22  ;;  %v1847_v27 = vld [vmem:[%s2683_s19 + $0x50] sm:$0xff] (!%p2291_p5)   ;;  %864 = vmatprep.subr.bf16.mxu0 (!%p2291_p5), %v1840_v20 }
 0x15e   : > { %664 = vst [vmem:[#allocation2] sm:$0xff] %v648_v31  ;;  %672 = vst [vmem:[#allocation2 + $0x40] sm:$0xff] %v656_v32  ;;  %v649_v39 = vadd.f32 %v588_v37, %v408_v29  ;;  %v657_v40 = vadd.f32 %v620_v38, %v416_v30  ;;  %v1846_v24 = vld [vmem:[%s2683_s19 + $0x8] sm:$0xff] (!%p2291_p5)   ;;  %1568 = vmatprep.subr.bf16.mxu1 (!%p2291_p5), %v1845_v23  ;;  %v1842_v28 = vld [vmem:[%s2682_s4 + $0x70] ss:$8 sps:$4 sm:$0xff] (!%p2291_p5)  }
 0x15f   : > { %667 = vst [vmem:[#allocation2 + $0x18] sm:$0xff] %v651_v35  ;;  %675 = vst [vmem:[#allocation2 + $0x58] sm:$0xff] %v659_v36  ;;  %v688_v29 = vld [vmem:[%s2269_s16 + $0x10] sm:$0xff] (!%p2291_p5)  ;;  %v689_v30 = vld [vmem:[%s2269_s16 + $0x18] sm:$0xff] (!%p2291_p5)  ;;  %865 = vmatpush1.bf16.msra.mxu0 (!%p2291_p5), %v1842_v28  ;;  %v760_v28 = vlaneseq (!%p2291_p5) }
 0x160   : > { %665 = vst [vmem:[#allocation2 + $0x8] sm:$0xff] %v649_v39  ;;  %673 = vst [vmem:[#allocation2 + $0x48] sm:$0xff] %v657_v40  ;;  %v1848_v32 = vld [vmem:[%s2683_s19 + $0x10] sm:$0xff] (!%p2291_p5)   ;;  %v1849_v34 = vld [vmem:[%s2683_s19 + $0x58] sm:$0xff] (!%p2291_p5)  }
 0x161   : > { %1569 = vmatpush3.bf16.msra.mxu1 (!%p2291_p5), %v1846_v24  ;;  %v1850_v36 = vld [vmem:[%s2683_s19 + $0x18] sm:$0xff] (!%p2291_p5)   ;;  %v1851_v37 = vld [vmem:[%s2683_s19 + $0x60] sm:$0xff] (!%p2291_p5)   ;;  %v1854_v22 = vld [vmem:[%s2683_s19 + $0x28] sm:$0xff] (!%p2291_p5)  }
 0x162   : > { %v1652_v45 = vpop.f32.mrb[4].mxu0  ;;  %v1660_v46 = vpop.f32.mrb[4].mxu1  ;;  %685 = sbr.rel (%p2291_p5) target bundleno = 865 (0x361), region = 60  ;;  %1570 = vmatprep.subr.bf16.mxu1 (!%p2291_p5), %v1847_v27  ;;  %v1852_v40 = vld [vmem:[%s2683_s19 + $0x20] sm:$0xff] (!%p2291_p5)   ;;  %v1855_v23 = vld [vmem:[%s2683_s19 + $0x70] sm:$0xff] (!%p2291_p5)   ;;  %v1857_v24 = vld [vmem:[%s2683_s19 + $0x78] sm:$0xff] (!%p2291_p5)  }
 0x163   : > { %v654_v49 = vadd.f32 %v1652_v45, %v413_v41  ;;  %v662_v50 = vadd.f32 %v1660_v46, %v421_v42  ;;  %v601_v51 = vpop.f32.mrb[5].mxu0  ;;  %v633_v52 = vpop.f32.mrb[5].mxu1  ;;  %v690_v42 = vld [vmem:[%s2269_s16 + $0x20] sm:$0xff] (!%p2291_p5)  ;;  %v1858_v27 = vld [vmem:[%s2683_s19 + $0x38] sm:$0xff] (!%p2291_p5)  }
 0x164   : > { %v652_v55 = vadd.f32 %v601_v51, %v411_v43  ;;  %v660_v56 = vadd.f32 %v633_v52, %v419_v44  ;;  %v1653_v57 = vpop.f32.mrb[6].mxu0  ;;  %v1661_v58 = vpop.f32.mrb[6].mxu1  ;;  %v704_v31 = vld [vmem:[#allocation2 + $0x10] sm:$0xff] (!%p2291_p5)  ;;  %v691_v43 = vld [vmem:[%s2269_s16 + $0x28] sm:$0xff] (!%p2291_p5) }
 0x165   : > { %670 = vst [vmem:[#allocation2 + $0x30] sm:$0xff] %v654_v49  ;;  %678 = vst [vmem:[#allocation2 + $0x70] sm:$0xff] %v662_v50  ;;  %v655_v59 = vadd.f32 %v1653_v57, %v414_v47  ;;  %v663_v60 = vadd.f32 %v1661_v58, %v422_v48  ;;  %v604_v61 = vpop.f32.mrb[7].mxu0  ;;  %v636_v62 = vpop.f32.mrb[7].mxu1  ;;  %v702_v18 = vld [vmem:[#allocation2] sm:$0xff] (!%p2291_p5)  ;;  %1571 = vmatpush3.bf16.msra.mxu1 (!%p2291_p5), %v1848_v32  ;;  %v2383_v38 = vadd.f32 (!%p2291_p5), %v704_v31, %v688_v29  ;;  %v692_v49 = vld [vmem:[%s2269_s16 + $0x30] sm:$0xff] (!%p2291_p5) }
 0x166   : > { %668 = vst [vmem:[#allocation2 + $0x20] sm:$0xff] %v652_v55  ;;  %676 = vst [vmem:[#allocation2 + $0x60] sm:$0xff] %v660_v56  ;;  %v653_v63 = vadd.f32 %v604_v61, %v412_v53  ;;  %v661_v0 = vadd.f32 %v636_v62, %v420_v54  ;;  %v2357_v25 = vadd.f32 (!%p2291_p5), %v702_v18, %v686_v16  ;;  %v705_v35 = vld [vmem:[#allocation2 + $0x18] sm:$0xff] (!%p2291_p5)  ;;  %1572 = vmatprep.subr.bf16.mxu1 (!%p2291_p5), %v1849_v34  ;;  %v694_v56 = vld [vmem:[%s2269_s16 + $0x40] sm:$0xff] (!%p2291_p5) }
 0x167   : > { %671 = vst [vmem:[#allocation2 + $0x38] sm:$0xff] %v655_v59  ;;  %679 = vst [vmem:[#allocation2 + $0x78] sm:$0xff] %v663_v60  ;;  %v703_v19 = vld [vmem:[#allocation2 + $0x8] sm:$0xff] (!%p2291_p5)  ;;  %v2385_v39 = vadd.f32 (!%p2291_p5), %v705_v35, %v689_v30  ;;  %v693_v50 = vld [vmem:[%s2269_s16 + $0x38] sm:$0xff] (!%p2291_p5)  ;;  %v761_v29 = vshrl.u32 (!%p2291_p5), %v760_v28, 7 }
 0x168   : > { %669 = vst [vmem:[#allocation2 + $0x28] sm:$0xff] %v653_v63  ;;  %677 = vst [vmem:[#allocation2 + $0x68] sm:$0xff] %v661_v0  ;;  %v2359_v26 = vadd.f32 (!%p2291_p5), %v703_v19, %v687_v17  ;;  %v695_v57 = vld [vmem:[%s2269_s16 + $0x48] sm:$0xff] (!%p2291_p5)  ;;  %v710_v58 = vld [vmem:[#allocation2 + $0x40] sm:$0xff] (!%p2291_p5) }
 0x169   : > { %1573 = vmatpush3.bf16.msra.mxu1 %v1850_v36  ;;  %v735_v41 = vpack.c.bf16 %v2385_v39, %v2383_v38  ;;  %v711_v59 = vld [vmem:[#allocation2 + $0x48] sm:$0xff]  ;;  %v2413_v60 = vadd.f32 %v710_v58, %v694_v56  ;;  %v696_v63 = vld [vmem:[%s2269_s16 + $0x50] sm:$0xff]  ;;  %v697_v0 = vld [vmem:[%s2269_s16 + $0x58] sm:$0xff]  ;;  %v762_v30 = vsub.s32 0, %v761_v29  ;;  %v766_v32 = vsub.s32 1, %v761_v29 }
 0x16a   : > { %v734_v33 = vpack.c.bf16 %v2359_v26, %v2357_v25  ;;  %1574 = vmatprep.subr.bf16.mxu1 %v1851_v37  ;;  %v2415_v61 = vadd.f32 %v711_v59, %v695_v57  ;;  %v712_v1 = vld [vmem:[#allocation2 + $0x50] sm:$0xff]  ;;  %v713_v2 = vld [vmem:[#allocation2 + $0x58] sm:$0xff]  ;;  %v758_v31 = vld [vmem:[%s2684_s24] sm:$0x3] }
 0x16b   : > { %v2422_v4 = vadd.f32 %v712_v1, %v696_v63  ;;  %v2424_v5 = vadd.f32 %v713_v2, %v697_v0  ;;  %v2470_v34 = vrot.slane %v758_v31, %v766_v32 }
 0x16c   : > { %883 = vmatmul.mubr.bf16.vlgmr.msra.gmra.mrb[0].mxu0 %v734_v33  ;;  %v708_v51 = vld [vmem:[#allocation2 + $0x30] sm:$0xff]  ;;  %v738_v62 = vpack.c.bf16 %v2415_v61, %v2413_v60  ;;  %v2468_v33 = vrot.slane %v758_v31, %v762_v30 }
 0x16d   : > { %892 = vmatprep.mubr.bf16.mxu0 %v2034_v3  ;;  %v706_v44 = vld [vmem:[#allocation2 + $0x20] sm:$0xff]  ;;  %1575 = vmatpush3.bf16.msra.mxu1 %v1852_v40  ;;  %v2404_v53 = vadd.f32 %v708_v51, %v692_v49  ;;  %v739_v6 = vpack.c.bf16 %v2424_v5, %v2422_v4  ;;  %v716_v16 = vld [vmem:[#allocation2 + $0x70] sm:$0xff] }
 0x16e   : > { %v2395_v46 = vadd.f32 %v706_v44, %v690_v42  ;;  %v709_v52 = vld [vmem:[#allocation2 + $0x38] sm:$0xff]  ;;  %v714_v9 = vld [vmem:[#allocation2 + $0x60] sm:$0xff]  ;;  %v2440_v18 = vadd.f32 %v716_v16, %v700_v14  ;;  %1576 = vmatprep.subr.bf16.mxu1 %v1853_v21 }
 0x16f   : > { %v707_v45 = vld [vmem:[#allocation2 + $0x28] sm:$0xff]  ;;  %v2406_v54 = vadd.f32 %v709_v52, %v693_v50  ;;  %v2431_v11 = vadd.f32 %v714_v9, %v698_v7  ;;  %v717_v17 = vld [vmem:[#allocation2 + $0x78] sm:$0xff] }
 0x170   : > { %v2397_v47 = vadd.f32 %v707_v45, %v691_v43  ;;  %v715_v10 = vld [vmem:[#allocation2 + $0x68] sm:$0xff]  ;;  %v2442_v19 = vadd.f32 %v717_v17, %v701_v15 }
 0x171   : > { %v737_v55 = vpack.c.bf16 %v2406_v54, %v2404_v53  ;;  %v2433_v12 = vadd.f32 %v715_v10, %v699_v8  ;;  %1577 = vmatpush3.bf16.msra.mxu1 %v1854_v22 }
 0x172   : > { %v736_v48 = vpack.c.bf16 %v2397_v47, %v2395_v46  ;;  %v741_v20 = vpack.c.bf16 %v2442_v19, %v2440_v18  ;;  %1578 = vmatprep.subr.bf16.mxu1 %v1855_v23 }
 0x173   : > { %v740_v13 = vpack.c.bf16 %v2433_v12, %v2431_v11 }
 0x174   : > { %893 = vmatmul.mubr.bf16.gmra.mrb[4].mxu0 %v735_v41 }
 0x175   : > { %902 = vmatprep.mubr.bf16.mxu0 %v2034_v3 }
 0x17c   : > { %903 = vmatmul.mubr.bf16.gmra.mrb[8].mxu0 %v736_v48 }
 0x17d   : > { %912 = vmatprep.mubr.bf16.mxu0 %v2034_v3 }
 0x184   : > { %913 = vmatmul.mubr.bf16.gmra.mrb[12].mxu0 %v737_v55 }
 0x185   : > { %922 = vmatprep.mubr.bf16.mxu0 %v2034_v3 }
 0x18c   : > { %923 = vmatmul.mubr.bf16.gmra.mrb[16].mxu0 %v738_v62 }
 0x18d   : > { %932 = vmatprep.mubr.bf16.mxu0 %v2034_v3 }
 0x194   : > { %933 = vmatmul.mubr.bf16.gmra.mrb[20].mxu0 %v739_v6 }
 0x195   : > { %942 = vmatprep.mubr.bf16.mxu0 %v2034_v3 }
 0x19c   : > { %943 = vmatmul.mubr.bf16.gmra.mrb[24].mxu0 %v740_v13 }
 0x19d   : > { %952 = vmatprep.mubr.bf16.mxu0 %v2034_v3  ;;  %v1856_v3 = vld [vmem:[%s2683_s19 + $0x30] sm:$0xff]  }
 0x19e   : > { %1579 = vmatpush3.bf16.msra.mxu1 %v1856_v3 }
 0x19f   : > { %1580 = vmatprep.subr.bf16.mxu1 %v1857_v24 }
 0x1a2   : > { %1581 = vmatpush3.bf16.msra.mxu1 %v1858_v27 }
 0x1a4   : > { %953 = vmatmul.mubr.bf16.gmra.mrb[28].mxu0 %v741_v20 }
 0x23f   : > { %v884_v35 = vpop.f32.mrb[0].mxu0 }
 0x240   : > { %v885_v36 = vadd.f32 %v884_v35, %v2468_v33  ;;  %v886_v37 = vpop.f32.mrb[1].mxu0 }
 0x241   : > { %v887_v40 = vadd.f32 %v886_v37, %v2470_v34  ;;  %v888_v41 = vpop.f32.mrb[2].mxu0 }
 0x242   : > { %v995_v42 = vmul.f32 0.01, %v885_v36  ;;  %v889_v43 = vadd.f32 %v888_v41, %v2468_v33  ;;  %v890_v44 = vpop.f32.mrb[3].mxu0  ;;  %vm963_vm0 = vcmp.ge.f32.partialorder %v885_v36, 0.0 }
 0x243   : > { %v996_v45 = vmul.f32 0.01, %v887_v40  ;;  %v891_v48 = vadd.f32 %v890_v44, %v2470_v34  ;;  %vm964_vm2 = vcmp.ge.f32.partialorder %v887_v40, 0.0 }
 0x244   : > { %vm965_vm1 = vcmp.ge.f32.partialorder %v889_v43, 0.0  ;;  %v997_v49 = vmul.f32 0.01, %v889_v43  ;;  %v1027_v51 = vsel %vm963_vm0, %v885_v36, %v995_v42 }
 0x245   : > { %v998_v50 = vmul.f32 0.01, %v891_v48  ;;  %vm966_vm3 = vcmp.ge.f32.partialorder %v891_v48, 0.0  ;;  %v1028_v56 = vsel %vm964_vm2, %v887_v40, %v996_v45 }
 0x246   : > { %v1029_v52 = vsel %vm965_vm1, %v889_v43, %v997_v49 }
 0x247   : > { %v894_v55 = vpop.f32.mrb[4].mxu0  ;;  %v1030_v57 = vsel %vm966_vm3, %v891_v48, %v998_v50  ;;  %v1059_v58 = vpack.c.bf16 %v1029_v52, %v1027_v51 }
 0x248   : > { %v895_v59 = vadd.f32 %v894_v55, %v2468_v33  ;;  %v896_v62 = vpop.f32.mrb[5].mxu0  ;;  %v1060_v63 = vpack.c.bf16 %v1030_v57, %v1028_v56 }
 0x249   : > { %v897_v0 = vadd.f32 %v896_v62, %v2470_v34  ;;  %v898_v1 = vpop.f32.mrb[6].mxu0 }
 0x24a   : > { %v999_v2 = vmul.f32 0.01, %v895_v59  ;;  %v899_v6 = vadd.f32 %v898_v1, %v2468_v33  ;;  %v900_v7 = vpop.f32.mrb[7].mxu0  ;;  %1242 = vmatprep.mubr.bf16.mxu1 %v1060_v63  ;;  %vm967_vm4 = vcmp.ge.f32.partialorder %v895_v59, 0.0 }
 0x24b   : > { %v1000_v8 = vmul.f32 0.01, %v897_v0  ;;  %v901_v9 = vadd.f32 %v900_v7, %v2470_v34  ;;  %1243 = vmatmul.mubr.bf16.vlgmr.msra.gmra.mrb[0].mxu1 %v1059_v58  ;;  %vm968_vm5 = vcmp.ge.f32.partialorder %v897_v0, 0.0 }
 0x24c   : > { %vm969_vm6 = vcmp.ge.f32.partialorder %v899_v6, 0.0  ;;  %v1001_v10 = vmul.f32 0.01, %v899_v6  ;;  %v1031_v14 = vsel %vm967_vm4, %v895_v59, %v999_v2 }
 0x24d   : > { %vm970_vm7 = vcmp.ge.f32.partialorder %v901_v9, 0.0  ;;  %v1002_v13 = vmul.f32 0.01, %v901_v9  ;;  %v1032_v17 = vsel %vm968_vm5, %v897_v0, %v1000_v8 }
 0x24e   : > { %v1033_v15 = vsel %vm969_vm6, %v899_v6, %v1001_v10 }
 0x24f   : > { %v904_v16 = vpop.f32.mrb[8].mxu0  ;;  %v1034_v20 = vsel %vm970_vm7, %v901_v9, %v1002_v13  ;;  %v1061_v21 = vpack.c.bf16 %v1033_v15, %v1031_v14 }
 0x250   : > { %v905_v22 = vadd.f32 %v904_v16, %v2468_v33  ;;  %v906_v23 = vpop.f32.mrb[9].mxu0  ;;  %v1062_v3 = vpack.c.bf16 %v1034_v20, %v1032_v17 }
 0x251   : > { %v907_v24 = vadd.f32 %v906_v23, %v2470_v34  ;;  %v908_v27 = vpop.f32.mrb[10].mxu0 }
 0x252   : > { %v1003_v28 = vmul.f32 0.01, %v905_v22  ;;  %v909_v29 = vadd.f32 %v908_v27, %v2468_v33  ;;  %v910_v30 = vpop.f32.mrb[11].mxu0  ;;  %1250 = vmatprep.mubr.bf16.mxu1 %v1062_v3  ;;  %vm971_vm8 = vcmp.ge.f32.partialorder %v905_v22, 0.0 }
 0x253   : > { %v1004_v31 = vmul.f32 0.01, %v907_v24  ;;  %v911_v32 = vadd.f32 %v910_v30, %v2470_v34  ;;  %1251 = vmatmul.mubr.bf16.gmra.mrb[4].mxu1 %v1061_v21  ;;  %vm972_vm9 = vcmp.ge.f32.partialorder %v907_v24, 0.0 }
 0x254   : > { %vm973_vm10 = vcmp.ge.f32.partialorder %v909_v29, 0.0  ;;  %v1005_v35 = vmul.f32 0.01, %v909_v29  ;;  %v1035_v37 = vsel %vm971_vm8, %v905_v22, %v1003_v28 }
 0x255   : > { %vm974_vm11 = vcmp.ge.f32.partialorder %v911_v32, 0.0  ;;  %v1006_v36 = vmul.f32 0.01, %v911_v32  ;;  %v1036_v42 = vsel %vm972_vm9, %v907_v24, %v1004_v31 }
 0x256   : > { %v1037_v40 = vsel %vm973_vm10, %v909_v29, %v1005_v35 }
 0x257   : > { %v914_v41 = vpop.f32.mrb[12].mxu0  ;;  %v1038_v43 = vsel %vm974_vm11, %v911_v32, %v1006_v36  ;;  %v1063_v44 = vpack.c.bf16 %v1037_v40, %v1035_v37 }
 0x258   : > { %v915_v45 = vadd.f32 %v914_v41, %v2468_v33  ;;  %v916_v48 = vpop.f32.mrb[13].mxu0  ;;  %v1064_v49 = vpack.c.bf16 %v1038_v43, %v1036_v42 }
 0x259   : > { %v917_v50 = vadd.f32 %v916_v48, %v2470_v34  ;;  %v918_v51 = vpop.f32.mrb[14].mxu0 }
 0x25a   : > { %v1007_v52 = vmul.f32 0.01, %v915_v45  ;;  %v919_v55 = vadd.f32 %v918_v51, %v2468_v33  ;;  %v920_v56 = vpop.f32.mrb[15].mxu0  ;;  %1258 = vmatprep.mubr.bf16.mxu1 %v1064_v49  ;;  %vm975_vm12 = vcmp.ge.f32.partialorder %v915_v45, 0.0 }
 0x25b   : > { %v1008_v57 = vmul.f32 0.01, %v917_v50  ;;  %v921_v58 = vadd.f32 %v920_v56, %v2470_v34  ;;  %1259 = vmatmul.mubr.bf16.gmra.mrb[8].mxu1 %v1063_v44  ;;  %vm976_vm13 = vcmp.ge.f32.partialorder %v917_v50, 0.0 }
 0x25c   : > { %vm977_vm14 = vcmp.ge.f32.partialorder %v919_v55, 0.0  ;;  %v1009_v59 = vmul.f32 0.01, %v919_v55  ;;  %v1039_v63 = vsel %vm975_vm12, %v915_v45, %v1007_v52 }
 0x25d   : > { %vm978_vm15 = vcmp.ge.f32.partialorder %v921_v58, 0.0  ;;  %v1010_v62 = vmul.f32 0.01, %v921_v58  ;;  %v1040_v2 = vsel %vm976_vm13, %v917_v50, %v1008_v57 }
 0x25e   : > { %v1041_v0 = vsel %vm977_vm14, %v919_v55, %v1009_v59 }
 0x25f   : > { %v924_v1 = vpop.f32.mrb[16].mxu0  ;;  %v1042_v6 = vsel %vm978_vm15, %v921_v58, %v1010_v62  ;;  %v1065_v7 = vpack.c.bf16 %v1041_v0, %v1039_v63 }
 0x260   : > { %v925_v8 = vadd.f32 %v924_v1, %v2468_v33  ;;  %v926_v9 = vpop.f32.mrb[17].mxu0  ;;  %v1066_v10 = vpack.c.bf16 %v1042_v6, %v1040_v2 }
 0x261   : > { %v927_v13 = vadd.f32 %v926_v9, %v2470_v34  ;;  %v928_v14 = vpop.f32.mrb[18].mxu0 }
 0x262   : > { %v1011_v15 = vmul.f32 0.01, %v925_v8  ;;  %v929_v16 = vadd.f32 %v928_v14, %v2468_v33  ;;  %v930_v17 = vpop.f32.mrb[19].mxu0  ;;  %1266 = vmatprep.mubr.bf16.mxu1 %v1066_v10  ;;  %vm979_vm0 = vcmp.ge.f32.partialorder %v925_v8, 0.0 }
 0x263   : > { %v1012_v20 = vmul.f32 0.01, %v927_v13  ;;  %v931_v21 = vadd.f32 %v930_v17, %v2470_v34  ;;  %1267 = vmatmul.mubr.bf16.gmra.mrb[12].mxu1 %v1065_v7  ;;  %vm980_vm1 = vcmp.ge.f32.partialorder %v927_v13, 0.0 }
 0x264   : > { %vm981_vm2 = vcmp.ge.f32.partialorder %v929_v16, 0.0  ;;  %v1013_v22 = vmul.f32 0.01, %v929_v16  ;;  %v1043_v3 = vsel %vm979_vm0, %v925_v8, %v1011_v15 }
 0x265   : > { %vm982_vm3 = vcmp.ge.f32.partialorder %v931_v21, 0.0  ;;  %v1014_v23 = vmul.f32 0.01, %v931_v21  ;;  %v1044_v28 = vsel %vm980_vm1, %v927_v13, %v1012_v20 }
 0x266   : > { %v1045_v24 = vsel %vm981_vm2, %v929_v16, %v1013_v22 }
 0x267   : > { %v934_v27 = vpop.f32.mrb[20].mxu0  ;;  %v1046_v29 = vsel %vm982_vm3, %v931_v21, %v1014_v23  ;;  %v1067_v30 = vpack.c.bf16 %v1045_v24, %v1043_v3 }
 0x268   : > { %v935_v31 = vadd.f32 %v934_v27, %v2468_v33  ;;  %v936_v32 = vpop.f32.mrb[21].mxu0  ;;  %v1068_v35 = vpack.c.bf16 %v1046_v29, %v1044_v28 }
 0x269   : > { %v937_v36 = vadd.f32 %v936_v32, %v2470_v34  ;;  %v938_v37 = vpop.f32.mrb[22].mxu0 }
 0x26a   : > { %v1015_v40 = vmul.f32 0.01, %v935_v31  ;;  %v939_v41 = vadd.f32 %v938_v37, %v2468_v33  ;;  %v940_v42 = vpop.f32.mrb[23].mxu0  ;;  %1274 = vmatprep.mubr.bf16.mxu1 %v1068_v35  ;;  %vm983_vm4 = vcmp.ge.f32.partialorder %v935_v31, 0.0 }
 0x26b   : > { %v1016_v43 = vmul.f32 0.01, %v937_v36  ;;  %v941_v44 = vadd.f32 %v940_v42, %v2470_v34  ;;  %1275 = vmatmul.mubr.bf16.gmra.mrb[16].mxu1 %v1067_v30  ;;  %vm984_vm5 = vcmp.ge.f32.partialorder %v937_v36, 0.0 }
 0x26c   : > { %vm985_vm6 = vcmp.ge.f32.partialorder %v939_v41, 0.0  ;;  %v1017_v45 = vmul.f32 0.01, %v939_v41  ;;  %v1047_v49 = vsel %vm983_vm4, %v935_v31, %v1015_v40 }
 0x26d   : > { %vm986_vm7 = vcmp.ge.f32.partialorder %v941_v44, 0.0  ;;  %v1018_v48 = vmul.f32 0.01, %v941_v44  ;;  %v1048_v52 = vsel %vm984_vm5, %v937_v36, %v1016_v43 }
 0x26e   : > { %v1049_v50 = vsel %vm985_vm6, %v939_v41, %v1017_v45 }
 0x26f   : > { %v944_v51 = vpop.f32.mrb[24].mxu0  ;;  %v1050_v55 = vsel %vm986_vm7, %v941_v44, %v1018_v48  ;;  %v1069_v56 = vpack.c.bf16 %v1049_v50, %v1047_v49 }
 0x270   : > { %v945_v57 = vadd.f32 %v944_v51, %v2468_v33  ;;  %v946_v58 = vpop.f32.mrb[25].mxu0  ;;  %v1070_v59 = vpack.c.bf16 %v1050_v55, %v1048_v52 }
 0x271   : > { %v947_v62 = vadd.f32 %v946_v58, %v2470_v34  ;;  %v948_v63 = vpop.f32.mrb[26].mxu0 }
 0x272   : > { %v1019_v0 = vmul.f32 0.01, %v945_v57  ;;  %v949_v1 = vadd.f32 %v948_v63, %v2468_v33  ;;  %v950_v2 = vpop.f32.mrb[27].mxu0  ;;  %1282 = vmatprep.mubr.bf16.mxu1 %v1070_v59  ;;  %vm987_vm8 = vcmp.ge.f32.partialorder %v945_v57, 0.0 }
 0x273   : > { %v1020_v6 = vmul.f32 0.01, %v947_v62  ;;  %v951_v7 = vadd.f32 %v950_v2, %v2470_v34  ;;  %1283 = vmatmul.mubr.bf16.gmra.mrb[20].mxu1 %v1069_v56  ;;  %vm988_vm9 = vcmp.ge.f32.partialorder %v947_v62, 0.0 }
 0x274   : > { %vm989_vm10 = vcmp.ge.f32.partialorder %v949_v1, 0.0  ;;  %v1021_v8 = vmul.f32 0.01, %v949_v1  ;;  %v1051_v10 = vsel %vm987_vm8, %v945_v57, %v1019_v0 }
 0x275   : > { %vm990_vm11 = vcmp.ge.f32.partialorder %v951_v7, 0.0  ;;  %v1022_v9 = vmul.f32 0.01, %v951_v7  ;;  %v1052_v15 = vsel %vm988_vm9, %v947_v62, %v1020_v6 }
 0x276   : > { %v1053_v13 = vsel %vm989_vm10, %v949_v1, %v1021_v8 }
 0x277   : > { %v954_v14 = vpop.f32.mrb[28].mxu0  ;;  %v1054_v16 = vsel %vm990_vm11, %v951_v7, %v1022_v9  ;;  %v1071_v17 = vpack.c.bf16 %v1053_v13, %v1051_v10 }
 0x278   : > { %v955_v20 = vadd.f32 %v954_v14, %v2468_v33  ;;  %v956_v21 = vpop.f32.mrb[29].mxu0  ;;  %v1072_v22 = vpack.c.bf16 %v1054_v16, %v1052_v15 }
 0x279   : > { %v957_v23 = vadd.f32 %v956_v21, %v2470_v34  ;;  %v958_v3 = vpop.f32.mrb[30].mxu0 }
 0x27a   : > { %v1023_v24 = vmul.f32 0.01, %v955_v20  ;;  %v959_v27 = vadd.f32 %v958_v3, %v2468_v33  ;;  %v960_v28 = vpop.f32.mrb[31].mxu0  ;;  %1290 = vmatprep.mubr.bf16.mxu1 %v1072_v22  ;;  %vm991_vm12 = vcmp.ge.f32.partialorder %v955_v20, 0.0 }
 0x27b   : > { %v1024_v29 = vmul.f32 0.01, %v957_v23  ;;  %v961_v30 = vadd.f32 %v960_v28, %v2470_v34  ;;  %1291 = vmatmul.mubr.bf16.gmra.mrb[24].mxu1 %v1071_v17  ;;  %vm992_vm13 = vcmp.ge.f32.partialorder %v957_v23, 0.0  ;;  %v2507_v34 = vld [vmem:[%s2685_s18] ss:$0 sm:$0xff] }
 0x27c   : > { %vm993_vm14 = vcmp.ge.f32.partialorder %v959_v27, 0.0  ;;  %v1025_v31 = vmul.f32 0.01, %v959_v27  ;;  %v1055_v35 = vsel %vm991_vm12, %v955_v20, %v1023_v24 }
 0x27d   : > { %vm994_vm15 = vcmp.ge.f32.partialorder %v961_v30, 0.0  ;;  %v1026_v32 = vmul.f32 0.01, %v961_v30  ;;  %v1056_v37 = vsel %vm992_vm13, %v957_v23, %v1024_v29 }
 0x27e   : > { %v1057_v36 = vsel %vm993_vm14, %v959_v27, %v1025_v31 }
 0x27f   : > { %v1058_v40 = vsel %vm994_vm15, %v961_v30, %v1026_v32  ;;  %v1073_v41 = vpack.c.bf16 %v1057_v36, %v1055_v35 }
 0x280   : > { %v1074_v42 = vpack.c.bf16 %v1058_v40, %v1056_v37 }
 0x282   : > { %1298 = vmatprep.mubr.bf16.mxu1 %v1074_v42 }
 0x283   : > { %1299 = vmatmul.mubr.bf16.gmra.mrb[28].mxu1 %v1073_v41 }
 0x31e   : > { %v1582_v33 = vpop.f32.mrb[0].mxu1 }
 0x31f   : > { %v1583_v43 = vpop.f32.mrb[1].mxu1 }
 0x320   : > { %v1584_v44 = vadd.f32 %v1583_v43, %v1582_v33  ;;  %v1585_v45 = vpop.f32.mrb[2].mxu1 }
 0x321   : > { %v1586_v48 = vpop.f32.mrb[3].mxu1 }
 0x322   : > { %v1245_v49 = vadd.f32 %v1584_v44, %v2507_v34  ;;  %v1587_v50 = vadd.f32 %v1586_v48, %v1585_v45 }
 0x324   : > { %v1307_v51 = vadd.f32 %v1245_v49, %v2357_v25  ;;  %v1248_v52 = vadd.f32 %v1587_v50, %v2507_v34 }
 0x326   : > { %1323 = vst [vmem:[%s2271_s3] sm:$0xff] %v1307_v51  ;;  %v1308_v55 = vadd.f32 %v1248_v52, %v2359_v26  ;;  %v1588_v56 = vpop.f32.mrb[4].mxu1 }
 0x327   : > { %v1589_v57 = vpop.f32.mrb[5].mxu1 }
 0x328   : > { %1324 = vst [vmem:[%s2271_s3 + $0x8] sm:$0xff] %v1308_v55  ;;  %v1590_v58 = vadd.f32 %v1589_v57, %v1588_v56  ;;  %v1591_v59 = vpop.f32.mrb[6].mxu1 }
 0x329   : > { %v1592_v62 = vpop.f32.mrb[7].mxu1 }
 0x32a   : > { %v1253_v63 = vadd.f32 %v1590_v58, %v2507_v34  ;;  %v1593_v0 = vadd.f32 %v1592_v62, %v1591_v59 }
 0x32c   : > { %v1309_v1 = vadd.f32 %v1253_v63, %v2383_v38  ;;  %v1256_v25 = vadd.f32 %v1593_v0, %v2507_v34 }
 0x32e   : > { %1325 = vst [vmem:[%s2271_s3 + $0x10] sm:$0xff] %v1309_v1  ;;  %v1310_v2 = vadd.f32 %v1256_v25, %v2385_v39  ;;  %v1594_v6 = vpop.f32.mrb[8].mxu1 }
 0x32f   : > { %v1595_v26 = vpop.f32.mrb[9].mxu1 }
 0x330   : > { %1326 = vst [vmem:[%s2271_s3 + $0x18] sm:$0xff] %v1310_v2  ;;  %v1596_v7 = vadd.f32 %v1595_v26, %v1594_v6  ;;  %v1597_v8 = vpop.f32.mrb[10].mxu1 }
 0x331   : > { %v1598_v9 = vpop.f32.mrb[11].mxu1 }
 0x332   : > { %v1261_v10 = vadd.f32 %v1596_v7, %v2507_v34  ;;  %v1599_v13 = vadd.f32 %v1598_v9, %v1597_v8 }
 0x334   : > { %v1311_v14 = vadd.f32 %v1261_v10, %v2395_v46  ;;  %v1264_v38 = vadd.f32 %v1599_v13, %v2507_v34 }
 0x336   : > { %1327 = vst [vmem:[%s2271_s3 + $0x20] sm:$0xff] %v1311_v14  ;;  %v1312_v15 = vadd.f32 %v1264_v38, %v2397_v47  ;;  %v1600_v16 = vpop.f32.mrb[12].mxu1 }
 0x337   : > { %v1601_v39 = vpop.f32.mrb[13].mxu1 }
 0x338   : > { %1328 = vst [vmem:[%s2271_s3 + $0x28] sm:$0xff] %v1312_v15  ;;  %v1602_v17 = vadd.f32 %v1601_v39, %v1600_v16  ;;  %v1603_v20 = vpop.f32.mrb[14].mxu1 }
 0x339   : > { %v1604_v21 = vpop.f32.mrb[15].mxu1 }
 0x33a   : > { %v1269_v22 = vadd.f32 %v1602_v17, %v2507_v34  ;;  %v1605_v23 = vadd.f32 %v1604_v21, %v1603_v20 }
 0x33c   : > { %v1313_v3 = vadd.f32 %v1269_v22, %v2404_v53  ;;  %v1272_v46 = vadd.f32 %v1605_v23, %v2507_v34 }
 0x33e   : > { %1329 = vst [vmem:[%s2271_s3 + $0x30] sm:$0xff] %v1313_v3  ;;  %v1314_v24 = vadd.f32 %v1272_v46, %v2406_v54  ;;  %v1606_v27 = vpop.f32.mrb[16].mxu1 }
 0x33f   : > { %v1607_v47 = vpop.f32.mrb[17].mxu1 }
 0x340   : > { %1330 = vst [vmem:[%s2271_s3 + $0x38] sm:$0xff] %v1314_v24  ;;  %v1608_v28 = vadd.f32 %v1607_v47, %v1606_v27  ;;  %v1609_v29 = vpop.f32.mrb[18].mxu1 }
 0x341   : > { %v1610_v30 = vpop.f32.mrb[19].mxu1 }
 0x342   : > { %v1277_v31 = vadd.f32 %v1608_v28, %v2507_v34  ;;  %v1611_v32 = vadd.f32 %v1610_v30, %v1609_v29 }
 0x344   : > { %v1315_v35 = vadd.f32 %v1277_v31, %v2413_v60  ;;  %v1280_v53 = vadd.f32 %v1611_v32, %v2507_v34 }
 0x346   : > { %1331 = vst [vmem:[%s2271_s3 + $0x40] sm:$0xff] %v1315_v35  ;;  %v1316_v36 = vadd.f32 %v1280_v53, %v2415_v61  ;;  %v1612_v37 = vpop.f32.mrb[20].mxu1 }
 0x347   : > { %v1613_v54 = vpop.f32.mrb[21].mxu1 }
 0x348   : > { %1332 = vst [vmem:[%s2271_s3 + $0x48] sm:$0xff] %v1316_v36  ;;  %v1614_v40 = vadd.f32 %v1613_v54, %v1612_v37  ;;  %v1615_v41 = vpop.f32.mrb[22].mxu1 }
 0x349   : > { %v1616_v42 = vpop.f32.mrb[23].mxu1 }
 0x34a   : > { %v1285_v33 = vadd.f32 %v1614_v40, %v2507_v34  ;;  %v1617_v43 = vadd.f32 %v1616_v42, %v1615_v41 }
 0x34c   : > { %v1317_v44 = vadd.f32 %v1285_v33, %v2422_v4  ;;  %v1288_v60 = vadd.f32 %v1617_v43, %v2507_v34 }
 0x34e   : > { %1333 = vst [vmem:[%s2271_s3 + $0x50] sm:$0xff] %v1317_v44  ;;  %v1318_v45 = vadd.f32 %v1288_v60, %v2424_v5  ;;  %v1618_v48 = vpop.f32.mrb[24].mxu1 }
 0x34f   : > { %v1619_v61 = vpop.f32.mrb[25].mxu1 }
 0x350   : > { %1334 = vst [vmem:[%s2271_s3 + $0x58] sm:$0xff] %v1318_v45  ;;  %v1620_v49 = vadd.f32 %v1619_v61, %v1618_v48  ;;  %v1621_v50 = vpop.f32.mrb[26].mxu1 }
 0x351   : > { %v1622_v51 = vpop.f32.mrb[27].mxu1 }
 0x352   : > { %v1293_v52 = vadd.f32 %v1620_v49, %v2507_v34  ;;  %v1623_v55 = vadd.f32 %v1622_v51, %v1621_v50 }
 0x354   : > { %v1319_v56 = vadd.f32 %v1293_v52, %v2431_v11  ;;  %v1296_v4 = vadd.f32 %v1623_v55, %v2507_v34 }
 0x356   : > { %1335 = vst [vmem:[%s2271_s3 + $0x60] sm:$0xff] %v1319_v56  ;;  %v1320_v57 = vadd.f32 %v1296_v4, %v2433_v12  ;;  %v1624_v58 = vpop.f32.mrb[28].mxu1 }
 0x357   : > { %v1625_v5 = vpop.f32.mrb[29].mxu1 }
 0x358   : > { %1336 = vst [vmem:[%s2271_s3 + $0x68] sm:$0xff] %v1320_v57  ;;  %v1626_v59 = vadd.f32 %v1625_v5, %v1624_v58  ;;  %v1627_v62 = vpop.f32.mrb[30].mxu1 }
 0x359   : > { %v1628_v63 = vpop.f32.mrb[31].mxu1 }
 0x35a   : > { %v1301_v0 = vadd.f32 %v1626_v59, %v2507_v34  ;;  %v1629_v1 = vadd.f32 %v1628_v63, %v1627_v62 }
 0x35c   : > { %v1321_v25 = vadd.f32 %v1301_v0, %v2440_v18  ;;  %v1304_v2 = vadd.f32 %v1629_v1, %v2507_v34 }
 0x35e   : > { %1337 = vst [vmem:[%s2271_s3 + $0x70] sm:$0xff] %v1321_v25  ;;  %v1322_v11 = vadd.f32 %v1304_v2, %v2442_v19 }
 0x360   : > { %1338 = vst [vmem:[%s2271_s3 + $0x78] sm:$0xff] %v1322_v11 }
 0x361 PF: > { %s2686_s21 = sld [smem:[#allocation13_spill]]  ;;  %s1549_s16 = sshll.u32 %s2011_s9, 11 }
 0x362   : > { %s2687_s8 = sld [smem:[#allocation20_spill]]  ;;  %s1353_s23 = sshll.u32 %s2271_s3, 4  ;;  %s2564_s23 = int_to_ptr.vmem [resolvable:$true] %s1353_s23 }
 0x363   : > { %s2689_s22 = sand.u32 1, %s1983_s25   ;;  %s1889_s20 = scalar_lea.vmem %s2564_s23, 2048 }
 0x364   : > { %s2568_s17 = scalar_lea.sflag [#allocation5], %s2689_s22  ;;  %p1890_p12 = scmp.ne.s32.totalorder %s2564_s23, %s1889_s20 }
 0x365   : > { %s2035_s9 = smov [#allocation6]  }
 0x366   : > { %s1893_s24 = sshll.u32 %s2035_s9, 4  ;;  %s1894_s24 = int_to_ptr.vmem [resolvable:$false] %s1893_s24 }
 0x367   : > { %p2690_p13 = scmp.ne.s32.totalorder %s2686_s21, 0  ;;  %s1895_s2 = scalar_lea.vmem %s1894_s24, 4096 }
 0x368   : > { %s2688_s15 = smov %s2687_s8  ;;  %s2561_s27 = scalar_lea.hbm %s2687_s8, %s1549_s16 }
 0x369   : > { %p1891_p8 = pnand %p1890_p12, %p2690_p13  ;;  %p1896_p0 = scmp.lt.s32.totalorder %s2564_s23, %s1894_s24 }
 0x36a   : > { %p1897_p11 = scmp.lt.s32.totalorder %s1895_s2, %s1889_s20 }
 0x36b   : > { %p1892_p10 = pneg %p1891_p8 }
 0x36c   : > { %p1898_p1 = por %p1897_p11, %p1896_p0 }
 0x36e   : > { %p1899_p7 = pnand %p1898_p1, %p1892_p10 }
 0x370   : > { %1902 = shalt.err (!%p1899_p7)
}
 0x371   : > { %s1903_s3 = scalar_lea.hbm %s2561_s27, 2048  ;;  %s1907_s16 = scalar_lea.hbm %s2688_s15, 4096 }
 0x372   : > { %p1904_p4 = scmp.ne.s32.totalorder %s2561_s27, %s1903_s3  ;;  %p1908_p6 = scmp.lt.u32.totalorder %s2561_s27, %s2688_s15 }
 0x373   : > { %p1909_p9 = scmp.lt.u32.totalorder %s1907_s16, %s1903_s3  ;;  %p1911_p12 = scmp.lt.u32.totalorder %s1903_s3, %s2561_s27 }
 0x374   : > { %p1905_p2 = pnand %p1904_p4, %p2690_p13 }
 0x375   : > { %p1910_p5 = por %p1909_p9, %p1908_p6 }
 0x376   : > { %p1906_p3 = pneg %p1905_p2 }
 0x377   : > { %p1912_p8 = por %p1911_p12, %p1910_p5 }
 0x379   : > { %p1913_p10 = pnand %p1912_p8, %p1906_p3 }
 0x37b   : > { %1916 = shalt.err (!%p1913_p10)
}
 0x37c   : > { %s2036_s8 = smov 128   ;;  %s2037_s22 = smov 8  }
 0x37d   : > { %1680 = dma.vmem_to_hbm [thread:$0]  (%p2690_p13), %s2564_s23, 2048, %s2561_s27, %s2568_s17, %s2036_s8, %s2036_s8, %s2037_s22  }
 0x37e PF: > { %s2691_s20 = sld [smem:[#allocation9_spill]]  ;;  %s2692_s9 = sld [smem:[#allocation14_spill]] }
 0x37f   : > { %p1691_p0 = scmp.ge.s32.totalorder %s2027_s13, 2 }
 0x384   : > { %s1368_s24 = sand.u32 1, %s2691_s20   ;;  %p2693_p11 = scmp.ne.s32.totalorder %s2692_s9, 0 }
 0x385   : > { %s1369_s2 = scalar_lea.sflag [#allocation5], %s1368_s24 }
 0x386   : > { %p1687_p1 = pnand %p1691_p0, %p2693_p11 }
 0x388   : > { %1974 = dma.done.wait (!%p1687_p1), %s1369_s2, 2048  }
 0x389   : > { %1976 = vsyncadd (!%p1687_p1), %s1369_s2, 4294965248  ;;  %s23_s13 = sadd.s32 1, %s2027_s13   ;;  %s2695_s21 = sld [smem:[#allocation10_spill]] }
 0x38a   : > { %p2597_p7 = scmp.ge.s32.totalorder %s23_s13, 18   ;;  %s2696_s23 = sld [smem:[#allocation11_spill]] }
 0x38b   : > { %s2697_s17 = sld [smem:[#allocation12_spill]]  ;;  %s2698_s24 = smov %s1983_s25 }
 0x38c   : > { %s2699_s25 = smov %s1987_s26  ;;  %s2700_s26 = smov %s2190_s14 }
 0x38d   : > { %s2701_s27 = smov %s1995_s28  ;;  %s2702_s28 = smov %s1999_s29 }
 0x38e   : > { %s2703_s29 = smov %s2195_s5  ;;  %s2704_s30 = smov %s2015_s10 }
 0x38f   : > { %s2705_s8 = smov %s2019_s11  ;;  %s2706_s9 = smov %s2023_s12 }
 0x390   : > { %s2707_s10 = smov %s2695_s21  ;;  %s2708_s11 = smov %s2696_s23 }
 0x391   : > { %s2709_s12 = smov %s2697_s17  ;;  %22 = sbr.rel (!%p2597_p7) target bundleno = 17 (0x11), region = 107 }
 0x398   :  { %1374 = vsyncpa [#allocation4], 1 }
 0x399   :  { %1376 = vsyncpa [#allocation4 + $0x1], 1 }
 0x39a   :  { %1377 = vsyncpa [#allocation5], 1 }
 0x39b   :  { %1379 = vsyncpa [#allocation5 + $0x1], 1 }

// kernel: encoder_layer_forward.2
= control target key start
LH: loop header
LB: loop body
LE: loop exit
PB: predicated region body
PF: predicated region fallthrough
CT: control target
= control target key end

     0   :  { %11 = vsyncpa [#allocation3], 0  ;;  %s2846_s0 = inlined_call_operand.hbm [shape: f32[256,128], index: 0, kind: input, shape index: {}]   ;;  %s2847_s1 = inlined_call_operand.vmem [shape: f32[1,128], index: 1, kind: input, shape index: {}]   ;;  %s2848_s2 = inlined_call_operand.vmem [shape: f32[1,128], index: 2, kind: input, shape index: {}]   ;;  %s2849_s3 = inlined_call_operand.hbm [shape: bf16[128,512], index: 3, kind: input, shape index: {}]   ;;  %s2850_s4 = inlined_call_operand.vmem [shape: f32[256,128], index: 4, kind: output, shape index: {0}]   ;;  %s2851_s5 = inlined_call_operand.vmem [shape: bf16[4,256,128], index: 5, kind: output, shape index: {1}]  }
   0x1   :  { %13 = vsyncpa [#allocation3 + $0x1], 0 }
   0x2   :  { %14 = vsyncpa [#allocation5], 0  ;;  %s2373_s18 = smov 0   ;;  %s2375_s19 = smov 0  }
   0x3   :  { %s2377_s20 = smov 0   ;;  %s2379_s21 = smov 0  }
   0x4 LB: > { %s2392_s22 = sadd.s32 4294967295, %s2334_s21   ;;  %p40_p0 = scmp.ne.s32.totalorder %s2326_s19, %s2322_s18  ;;  %s2334_s21 = sphi %s2379_s21, %s2869_s21   ;;  %s2330_s20 = sphi %s2377_s20, %s2868_s20   ;;  %s2326_s19 = sphi %s2375_s19, %s2867_s19   ;;  %s2322_s18 = sphi %s2373_s18, %s2866_s18  }
   0x5   : > { %p2852_p1 = scmp.eq.s32.totalorder %s2392_s22, 0  ;;  %p1683_p3 = scmp.ge.s32.totalorder %s2334_s21, 1 }
   0x6   : > { %p166_p4 = scmp.lt.s32.totalorder %s2334_s21, 3  ;;  %s2336_s25 = smov [#allocation4]  }
   0x7   : > { %p2401_p5 = por %p2852_p1, %p40_p0  ;;  %s184_s26 = sshll.u32 %s2336_s25, 4  ;;  %s185_s26 = int_to_ptr.vmem [resolvable:$true] %s184_s26 }
   0x8   : > { %p2405_p6 = pnand %p1683_p3, %p166_p4  ;;  %s2418_s28 = sadd.s32 1, %s2334_s21  }
   0x9   : > { %s2855_s23 = scalar_select %p2401_p5, 1, 0 }
   0xa   : > { %s2856_s24 = scalar_select %p2405_p6, 1, 0 }
   0xb   : > { %p2109_p7 = pneg %p2405_p6  ;;  %s24_s29 = ssub.s32 %s2334_s21, %s2418_s28 }
   0xc   : > { %s2238_s7 = scalar_lea.hbm %s2849_s3, 4096 }
   0xd   : > { %p2413_p8 = pnand %p2109_p7, %p2852_p1  ;;  %p2239_p9 = scmp.ne.s32.totalorder %s2849_s3, %s2238_s7 }
   0xe   : > { %p2245_p13 = scmp.lt.u32.totalorder %s2238_s7, %s2849_s3 }
   0xf   : > { %p2240_p10 = pneg %p2413_p8 }
  0x11   : > { %p2241_p11 = pnand %p2240_p10, %p2239_p9 }
  0x13   : > { %p2242_p12 = pneg %p2241_p11 }
  0x15   : > { %p2247_p0 = pnand %p2245_p13, %p2242_p12 }
  0x17   : > { %2250 = shalt.err (!%p2247_p0)
}
  0x18   : > { %s2251_s12 = scalar_lea.vmem %s185_s26, 4096  ;;  %p2259_p1 = scmp.lt.s32.totalorder %s185_s26, %s185_s26 }
  0x19   : > { %p2252_p3 = scmp.ne.s32.totalorder %s185_s26, %s2251_s12  ;;  %p2260_p2 = scmp.lt.s32.totalorder %s2251_s12, %s2251_s12 }
  0x1b   : > { %p2254_p4 = pnand %p2252_p3, %p2240_p10  ;;  %p2261_p5 = por %p2260_p2, %p2259_p1 }
  0x1d   : > { %p2255_p7 = pneg %p2254_p4 }
  0x1f   : > { %p2262_p6 = pnand %p2261_p5, %p2255_p7 }
  0x21   : > { %2265 = shalt.err (!%p2262_p6)
}
  0x22   : > { %s2337_s13 = smov 256   ;;  %s2338_s14 = smov 16  }
  0x23   : > { %2112 = dma.hbm_to_vmem [thread:$0]  (!%p2413_p8), %s2849_s3, 4096, %s185_s26, [#allocation5], %s2337_s13, %s2337_s13, %s2338_s14  }
  0x24   : > { %p25_p1 = scmp.eq.s32.totalorder %s24_s29, 0  ;;  %s27_s17 = sadd.s32 1, %s2330_s20 }
  0x25   : > { %p34_p2 = scmp.ne.s32.totalorder %s2330_s20, %s2326_s19  ;;  %p35_p5 = scmp.eq.s32.totalorder %s2334_s21, 0 }
  0x26   : > { %s2443_s18 = scalar_select %p25_p1, %s2330_s20, %s27_s17  }
  0x27   : > { %p36_p6 = por %p35_p5, %p34_p2  ;;  %p2858_p9 = scmp.eq.s32.totalorder %s2392_s22, 1 }
  0x28   : > { %p2118_p11 = scmp.lt.s32.totalorder %s2334_s21, 2  ;;  %s198_s30 = sand.u32 1, %s2330_s20  }
  0x29   : > { %p2447_p10 = por %p2858_p9, %p34_p2  ;;  %s1686_s6 = sshll.u32 %s198_s30, 7 }
  0x2a   : > { %s1846_s27 = sshll.u32 %s2334_s21, 11  ;;  %s202_s29 = scalar_lea.vmem [#allocation2], %s1686_s6 }
  0x2b   : > { %s2457_s26 = scalar_lea.hbm %s2846_s0, %s1846_s27  ;;  %s209_s9 = sshll.u32 %s202_s29, 4  ;;  %s2459_s9 = int_to_ptr.vmem [resolvable:$true] %s209_s9 }
  0x2c   : > { %p2461_p8 = pnand %p2118_p11, %p36_p6  ;;  %s2465_s21 = scalar_lea.sflag [#allocation3], %s198_s30 }
  0x2d   : > { %s2266_s11 = scalar_lea.hbm %s2457_s26, 2048  ;;  %s2271_s14 = scalar_lea.hbm %s2846_s0, 4096 }
  0x2e   : > { %p2267_p12 = scmp.ne.s32.totalorder %s2457_s26, %s2266_s11  ;;  %p2268_p13 = pneg %p2461_p8 }
  0x2f   : > { %p2272_p4 = scmp.lt.u32.totalorder %s2457_s26, %s2846_s0  ;;  %p2273_p7 = scmp.lt.u32.totalorder %s2271_s14, %s2266_s11 }
  0x30   : > { %p2269_p0 = pnand %p2268_p13, %p2267_p12  ;;  %p2275_p2 = scmp.lt.u32.totalorder %s2266_s11, %s2457_s26 }
  0x31   : > { %p2274_p1 = por %p2273_p7, %p2272_p4 }
  0x32   : > { %p2270_p3 = pneg %p2269_p0 }
  0x33   : > { %p2276_p5 = por %p2275_p2, %p2274_p1 }
  0x35   : > { %p2277_p6 = pnand %p2276_p5, %p2270_p3 }
  0x37   : > { %2280 = shalt.err (!%p2277_p6)
}
  0x38   : > { %s2281_s17 = scalar_lea.vmem %s2459_s9, 2048  ;;  %s2339_s30 = smov [#allocation2]  }
  0x39   : > { %p2282_p9 = scmp.ne.s32.totalorder %s2459_s9, %s2281_s17  ;;  %s2286_s6 = sshll.u32 %s2339_s30, 4  ;;  %s2287_s6 = int_to_ptr.vmem [resolvable:$false] %s2286_s6 }
  0x3a   : > { %s2288_s27 = scalar_lea.vmem %s2287_s6, 4096  ;;  %p2289_p0 = scmp.lt.s32.totalorder %s2459_s9, %s2287_s6 }
  0x3b   : > { %p2284_p11 = pnand %p2282_p9, %p2268_p13  ;;  %p2290_p4 = scmp.lt.s32.totalorder %s2288_s27, %s2281_s17 }
  0x3d   : > { %p2285_p12 = pneg %p2284_p11  ;;  %p2291_p7 = por %p2290_p4, %p2289_p0 }
  0x3f   : > { %p2292_p1 = pnand %p2291_p7, %p2285_p12 }
  0x41   : > { %2295 = shalt.err (!%p2292_p1)
}
  0x42   : > { %s2340_s7 = smov 128   ;;  %s2341_s8 = smov 8  }
  0x43   : > { %2116 = dma.hbm_to_vmem [thread:$0]  (!%p2461_p8), %s2457_s26, 2048, %s2459_s9, %s2465_s21, %s2340_s7, %s2340_s7, %s2341_s8  }
  0x44   : > { %p2861_p13 = scmp.ne.s32.totalorder %s2856_s24, 0 }
  0x45   : > { %s2496_s29 = sand.u32 (!%p2861_p13), 1, %s2326_s19   ;;  %p2862_p3 = scmp.ne.s32.totalorder (!%p2861_p13), %s2855_s23, 0 }
  0x46   : > { %221 = sbr.rel (%p2861_p13) target bundleno = 683 (0x2ab), region = 36  ;;  %s1690_s11 = sshll.u32 (!%p2861_p13), %s2496_s29, 7 }
  0x47   : > { %s224_s12 = scalar_lea.sflag (!%p2861_p13), [#allocation3], %s2496_s29  ;;  %s2500_s13 = scalar_lea.vmem (!%p2861_p13), [#allocation2], %s1690_s11 }
  0x4d   : > { %2313 = dma.done.wait (%p2862_p3), %s224_s12, 2048  }
  0x4e   : > { %2315 = vsyncadd (%p2862_p3), %s224_s12, 4294965248  ;;  %p2863_p8 = scmp.eq.s32.totalorder %s2392_s22, 0 }
  0x50   : > { %2317 = dma.done.wait (%p2863_p8), [#allocation5], 4096   ;;  %p2864_p2 = pmov %p2863_p8 }
  0x51   : > { %v271_v0 = vld [vmem:[%s2500_s13] sm:$0xff]  ;;  %v273_v1 = vld [vmem:[%s2500_s13 + $0x10] sm:$0xff]  ;;  %v272_v2 = vld [vmem:[%s2500_s13 + $0x8] sm:$0xff]  ;;  %s1693_s23 = sshll.u32 %s2392_s22, 4  ;;  %s1692_s17 = sshll.u32 %s2496_s29, 8 }
  0x52   : > { %2319 = vsyncadd (%p2864_p2), [#allocation5], 4294963200  ;;  %287 = vadd.xlane.f32.xlu0 %v271_v0  ;;  %291 = vadd.xlane.f32.xlu1 %v273_v1  ;;  %v274_v3 = vld [vmem:[%s2500_s13 + $0x18] sm:$0xff]  ;;  %v275_v4 = vld [vmem:[%s2500_s13 + $0x20] sm:$0xff]  ;;  %p264_p5 = scmp.lt.s32.totalorder %s1693_s23, 31  ;;  %s2727_s30 = scalar_lea.vmem [#allocation6], %s1692_s17 }
  0x53   : > { %v276_v5 = vld [vmem:[%s2500_s13 + $0x28] sm:$0xff]  ;;  %v2517_v6 = vld [vmem:[%s2500_s13 + $0x30] sm:$0xff]  ;;  %v2520_v7 = vld [vmem:[%s2500_s13 + $0x38] sm:$0xff]  ;;  %s1911_s6 = sshll.u32 (%p2447_p10), %s2392_s22, 6 }
  0x54   : > { %v2523_v8 = vld [vmem:[%s2500_s13 + $0x40] sm:$0xff]  ;;  %v2526_v9 = vld [vmem:[%s2500_s13 + $0x48] sm:$0xff]  ;;  %v2533_v10 = vld [vmem:[%s2500_s13 + $0x50] sm:$0xff]  ;;  %s2871_s23 = smov (!%p264_p5, %s1693_s23), 31  ;;  %s2770_s8 = scalar_lea.vmem (%p2447_p10), %s2851_s5, %s1911_s6 }
  0x55   : > { %v2536_v11 = vld [vmem:[%s2500_s13 + $0x58] sm:$0xff]  ;;  %v2541_v12 = vld [vmem:[%s2500_s13 + $0x60] sm:$0xff]  ;;  %v2544_v13 = vld [vmem:[%s2500_s13 + $0x68] sm:$0xff]  ;;  %s1694_s9 = sshll.u32 %s2871_s23, 3 }
  0x56   : > { %289 = vadd.xlane.f32.xlu0 %v272_v2  ;;  %293 = vadd.xlane.f32.xlu1 %v274_v3  ;;  %v2549_v14 = vld [vmem:[%s2500_s13 + $0x70] sm:$0xff]  ;;  %v2552_v15 = vld [vmem:[%s2500_s13 + $0x78] sm:$0xff]  ;;  %s2648_s16 = scalar_lea.vmem %s2850_s4, %s1694_s9 }
  0x57   : > { %v2158_v16 = vld [vmem:[#allocation4 + $0x4] ss:$16 sps:$4 sm:$0xff]   ;;  %v2160_v17 = vld [vmem:[#allocation4 + $0xc] ss:$16 sps:$4 sm:$0xff]   ;;  %v2162_v18 = vld [vmem:[#allocation4] ss:$16 sps:$4 sm:$0xff]  }
  0x58   : > { %v2163_v19 = vld [vmem:[#allocation4 + $0x8] ss:$16 sps:$4 sm:$0xff]   ;;  %v2164_v20 = vld [vmem:[#allocation4 + $0x24] ss:$16 sps:$4 sm:$0xff]   ;;  %v2166_v21 = vld [vmem:[#allocation4 + $0x2c] ss:$16 sps:$4 sm:$0xff]   ;;  %726 = vmatprep.subr.bf16.mxu0 %v2158_v16  ;;  %839 = vmatprep.subr.bf16.mxu1 %v2160_v17 }
  0x59   : > { %727 = vmatpush1.bf16.msra.mxu0 %v2162_v18  ;;  %840 = vmatpush1.bf16.msra.mxu1 %v2163_v19  ;;  %v2168_v60 = vld [vmem:[#allocation4 + $0x20] ss:$16 sps:$4 sm:$0xff]   ;;  %v2169_v61 = vld [vmem:[#allocation4 + $0x28] ss:$16 sps:$4 sm:$0xff]  }
  0x5a   : > { %295 = vadd.xlane.f32.xlu0 %v275_v4  ;;  %297 = vadd.xlane.f32.xlu1 %v276_v5  ;;  %v2174_v16 = vld [vmem:[#allocation4 + $0x40] ss:$16 sps:$4 sm:$0xff]   ;;  %v2175_v17 = vld [vmem:[#allocation4 + $0x48] ss:$16 sps:$4 sm:$0xff]  }
  0x5b   : > { %728 = vmatprep.subr.bf16.mxu0 %v2164_v20  ;;  %841 = vmatprep.subr.bf16.mxu1 %v2166_v21 }
  0x5d   : > { %729 = vmatpush1.bf16.msra.mxu0 %v2168_v60  ;;  %842 = vmatpush1.bf16.msra.mxu1 %v2169_v61 }
  0x5e   : > { %299 = vadd.xlane.f32.xlu0 %v2517_v6  ;;  %301 = vadd.xlane.f32.xlu1 %v2520_v7 }
  0x62   : > { %303 = vadd.xlane.f32.xlu0 %v2523_v8  ;;  %305 = vadd.xlane.f32.xlu1 %v2526_v9 }
  0x66   : > { %307 = vadd.xlane.f32.xlu0 %v2533_v10  ;;  %309 = vadd.xlane.f32.xlu1 %v2536_v11 }
  0x6a   : > { %311 = vadd.xlane.f32.xlu0 %v2541_v12  ;;  %313 = vadd.xlane.f32.xlu1 %v2544_v13 }
  0x6e   : > { %315 = vadd.xlane.f32.xlu0 %v2549_v14  ;;  %317 = vadd.xlane.f32.xlu1 %v2552_v15 }
  0xdf   : > { %v288_v22 = vpop.xlane.xlu0 %287  ;;  %v292_v23 = vpop.xlane.xlu1 %291 }
  0xe0   : > { %v320_v24 = vmul.f32 0.0078125, %v288_v22  ;;  %v322_v25 = vmul.f32 0.0078125, %v292_v23  ;;  %v2176_v22 = vld [vmem:[#allocation4 + $0x64] ss:$16 sps:$4 sm:$0xff]   ;;  %v2178_v23 = vld [vmem:[#allocation4 + $0x6c] ss:$16 sps:$4 sm:$0xff]  }
  0xe2   : > { %v2556_v26 = vsub.f32 %v271_v0, %v320_v24  ;;  %v2558_v27 = vsub.f32 %v273_v1, %v322_v25 }
  0xe3   : > { %v290_v28 = vpop.xlane.xlu0 %289  ;;  %v294_v29 = vpop.xlane.xlu1 %293 }
  0xe4   : > { %v321_v30 = vmul.f32 0.0078125, %v290_v28  ;;  %v352_v31 = vmul.f32 %v2556_v26, %v2556_v26  ;;  %v323_v32 = vmul.f32 0.0078125, %v294_v29  ;;  %v354_v35 = vmul.f32 %v2558_v27, %v2558_v27  ;;  %v2180_v28 = vld [vmem:[#allocation4 + $0x60] ss:$16 sps:$4 sm:$0xff]   ;;  %v2181_v29 = vld [vmem:[#allocation4 + $0x68] ss:$16 sps:$4 sm:$0xff]  }
  0xe6   : > { %v2562_v33 = vsub.f32 %v272_v2, %v321_v30  ;;  %368 = vadd.xlane.f32.xlu0 %v352_v31  ;;  %v2564_v34 = vsub.f32 %v274_v3, %v323_v32  ;;  %v2170_v3 = vld [vmem:[#allocation4 + $0x44] ss:$16 sps:$4 sm:$0xff]  }
  0xe7   : > { %v296_v36 = vpop.xlane.xlu0 %295  ;;  %v298_v37 = vpop.xlane.xlu1 %297  ;;  %730 = vmatprep.subr.bf16.mxu0 %v2170_v3 }
  0xe8   : > { %v324_v38 = vmul.f32 0.0078125, %v296_v36  ;;  %v353_v39 = vmul.f32 %v2562_v33, %v2562_v33  ;;  %v325_v40 = vmul.f32 0.0078125, %v298_v37  ;;  %v355_v43 = vmul.f32 %v2564_v34, %v2564_v34  ;;  %731 = vmatpush1.bf16.msra.mxu0 %v2174_v16  ;;  %v2182_v36 = vld [vmem:[#allocation4 + $0x84] ss:$16 sps:$4 sm:$0xff]   ;;  %v2184_v37 = vld [vmem:[#allocation4 + $0x8c] ss:$16 sps:$4 sm:$0xff]  }
  0xe9   : > { %732 = vmatprep.subr.bf16.mxu0 %v2176_v22 }
  0xea   : > { %v2570_v41 = vsub.f32 %v275_v4, %v324_v38  ;;  %372 = vadd.xlane.f32.xlu0 %v354_v35  ;;  %370 = vadd.xlane.f32.xlu1 %v353_v39  ;;  %v2572_v42 = vsub.f32 %v276_v5, %v325_v40  ;;  %v2172_v4 = vld [vmem:[#allocation4 + $0x4c] ss:$16 sps:$4 sm:$0xff]   ;;  %v2186_v38 = vld [vmem:[#allocation4 + $0x80] ss:$16 sps:$4 sm:$0xff]   ;;  %v2187_v39 = vld [vmem:[#allocation4 + $0x88] ss:$16 sps:$4 sm:$0xff]  }
  0xeb   : > { %v300_v44 = vpop.xlane.xlu0 %299  ;;  %v302_v45 = vpop.xlane.xlu1 %301  ;;  %843 = vmatprep.subr.bf16.mxu1 %v2172_v4 }
  0xec   : > { %v326_v46 = vmul.f32 0.0078125, %v300_v44  ;;  %v356_v47 = vmul.f32 %v2570_v41, %v2570_v41  ;;  %v327_v48 = vmul.f32 0.0078125, %v302_v45  ;;  %v357_v51 = vmul.f32 %v2572_v42, %v2572_v42  ;;  %844 = vmatpush1.bf16.msra.mxu1 %v2175_v17  ;;  %733 = vmatpush1.bf16.msra.mxu0 %v2180_v28  ;;  %v2192_v44 = vld [vmem:[#allocation4 + $0xa0] ss:$16 sps:$4 sm:$0xff]   ;;  %v2193_v45 = vld [vmem:[#allocation4 + $0xa8] ss:$16 sps:$4 sm:$0xff]  }
  0xed   : > { %845 = vmatprep.subr.bf16.mxu1 %v2178_v23  ;;  %734 = vmatprep.subr.bf16.mxu0 %v2182_v36 }
  0xee   : > { %v2579_v49 = vsub.f32 %v2517_v6, %v326_v46  ;;  %374 = vadd.xlane.f32.xlu1 %v355_v43  ;;  %376 = vadd.xlane.f32.xlu0 %v356_v47  ;;  %v2582_v50 = vsub.f32 %v2520_v7, %v327_v48  ;;  %v2190_v43 = vld [vmem:[#allocation4 + $0xac] ss:$16 sps:$4 sm:$0xff]   ;;  %v2194_v46 = vld [vmem:[#allocation4 + $0xc4] ss:$16 sps:$4 sm:$0xff]   ;;  %v2198_v48 = vld [vmem:[#allocation4 + $0xc0] ss:$16 sps:$4 sm:$0xff]  }
  0xef   : > { %v304_v52 = vpop.xlane.xlu0 %303  ;;  %v306_v53 = vpop.xlane.xlu1 %305  ;;  %v2196_v47 = vld [vmem:[#allocation4 + $0xcc] ss:$16 sps:$4 sm:$0xff]  }
  0xf0   : > { %v328_v54 = vmul.f32 0.0078125, %v304_v52  ;;  %v358_v55 = vmul.f32 %v2579_v49, %v2579_v49  ;;  %v329_v56 = vmul.f32 0.0078125, %v306_v53  ;;  %v359_v59 = vmul.f32 %v2582_v50, %v2582_v50  ;;  %846 = vmatpush1.bf16.msra.mxu1 %v2181_v29  ;;  %735 = vmatpush1.bf16.msra.mxu0 %v2186_v38  ;;  %v2200_v52 = vld [vmem:[#allocation4 + $0xe4] ss:$16 sps:$4 sm:$0xff]   ;;  %v2202_v53 = vld [vmem:[#allocation4 + $0xec] ss:$16 sps:$4 sm:$0xff]  }
  0xf1   : > { %847 = vmatprep.subr.bf16.mxu1 %v2184_v37 }
  0xf2   : > { %v2589_v57 = vsub.f32 %v2523_v8, %v328_v54  ;;  %378 = vadd.xlane.f32.xlu1 %v357_v51  ;;  %380 = vadd.xlane.f32.xlu0 %v358_v55  ;;  %v2592_v58 = vsub.f32 %v2526_v9, %v329_v56  ;;  %v2199_v51 = vld [vmem:[#allocation4 + $0xc8] ss:$16 sps:$4 sm:$0xff]   ;;  %v2204_v54 = vld [vmem:[#allocation4 + $0xe0] ss:$16 sps:$4 sm:$0xff]   ;;  %v2342_v56 = vmov 0  }
  0xf3   : > { %v308_v62 = vpop.xlane.xlu0 %307  ;;  %v310_v63 = vpop.xlane.xlu1 %309  ;;  %v2205_v55 = vld [vmem:[#allocation4 + $0xe8] ss:$16 sps:$4 sm:$0xff]   ;;  %758 = vmatprep.mubr.bf16.mxu0 %v2342_v56  ;;  %871 = vmatprep.mubr.bf16.mxu1 %v2342_v56 }
  0xf4   : > { %v330_v0 = vmul.f32 0.0078125, %v308_v62  ;;  %v360_v1 = vmul.f32 %v2589_v57, %v2589_v57  ;;  %v331_v2 = vmul.f32 0.0078125, %v310_v63  ;;  %v361_v7 = vmul.f32 %v2592_v58, %v2592_v58  ;;  %848 = vmatpush1.bf16.msra.mxu1 %v2187_v39 }
  0xf5   : > { %849 = vmatprep.subr.bf16.mxu1 %v2190_v43 }
  0xf6   : > { %v2599_v5 = vsub.f32 %v2533_v10, %v330_v0  ;;  %382 = vadd.xlane.f32.xlu1 %v359_v59  ;;  %384 = vadd.xlane.f32.xlu0 %v360_v1  ;;  %v2602_v6 = vsub.f32 %v2536_v11, %v331_v2 }
  0xf7   : > { %v312_v8 = vpop.xlane.xlu0 %311  ;;  %v314_v9 = vpop.xlane.xlu1 %313 }
  0xf8   : > { %v332_v18 = vmul.f32 0.0078125, %v312_v8  ;;  %v362_v19 = vmul.f32 %v2599_v5, %v2599_v5  ;;  %v333_v10 = vmul.f32 0.0078125, %v314_v9  ;;  %v363_v21 = vmul.f32 %v2602_v6, %v2602_v6  ;;  %850 = vmatpush1.bf16.msra.mxu1 %v2193_v45 }
  0xf9   : > { %851 = vmatprep.subr.bf16.mxu1 %v2196_v47 }
  0xfa   : > { %v2609_v20 = vsub.f32 %v2541_v12, %v332_v18  ;;  %386 = vadd.xlane.f32.xlu1 %v361_v7  ;;  %388 = vadd.xlane.f32.xlu0 %v362_v19  ;;  %v2612_v11 = vsub.f32 %v2544_v13, %v333_v10 }
  0xfb   : > { %v316_v24 = vpop.xlane.xlu0 %315  ;;  %v318_v25 = vpop.xlane.xlu1 %317 }
  0xfc   : > { %v334_v30 = vmul.f32 0.0078125, %v316_v24  ;;  %v364_v31 = vmul.f32 %v2609_v20, %v2609_v20  ;;  %v335_v12 = vmul.f32 0.0078125, %v318_v25  ;;  %v365_v35 = vmul.f32 %v2612_v11, %v2612_v11  ;;  %852 = vmatpush1.bf16.msra.mxu1 %v2199_v51  ;;  %v2636_v25 = vld [vmem:[%s2847_s1] ss:$0 sm:$0xff] }
  0xfd   : > { %853 = vmatprep.subr.bf16.mxu1 %v2202_v53 }
  0xfe   : > { %v2619_v13 = vsub.f32 %v2549_v14, %v334_v30  ;;  %390 = vadd.xlane.f32.xlu1 %v363_v21  ;;  %392 = vadd.xlane.f32.xlu0 %v364_v31  ;;  %v2622_v32 = vsub.f32 %v2552_v15, %v335_v12  ;;  %v2188_v15 = vld [vmem:[#allocation4 + $0xa4] ss:$16 sps:$4 sm:$0xff]  }
  0xff   : > { %736 = vmatprep.subr.bf16.mxu0 %v2188_v15 }
 0x100   : > { %v366_v40 = vmul.f32 %v2619_v13, %v2619_v13  ;;  %v367_v14 = vmul.f32 %v2622_v32, %v2622_v32  ;;  %737 = vmatpush1.bf16.msra.mxu0 %v2192_v44  ;;  %854 = vmatpush1.bf16.msra.mxu1 %v2205_v55 }
 0x101   : > { %738 = vmatprep.subr.bf16.mxu0 %v2194_v46 }
 0x102   : > { %394 = vadd.xlane.f32.xlu1 %v365_v35  ;;  %396 = vadd.xlane.f32.xlu0 %v366_v40  ;;  %v2642_v35 = vld [vmem:[%s2848_s2] ss:$0 sm:$0xff] }
 0x104   : > { %739 = vmatpush1.bf16.msra.mxu0 %v2198_v48 }
 0x105   : > { %740 = vmatprep.subr.bf16.mxu0 %v2200_v52 }
 0x106   : > { %398 = vadd.xlane.f32.xlu1 %v367_v14 }
 0x108   : > { %741 = vmatpush1.bf16.msra.mxu0 %v2204_v54 }
 0x173   : > { %v369_v59 = vpop.xlane.xlu0 %368 }
 0x174   : > { %v400_v60 = vmul.f32 0.0078125, %v369_v59 }
 0x176   : > { %v416_v61 = vadd.f32 1e-06, %v400_v60 }
 0x177   : > { %v371_v62 = vpop.xlane.xlu1 %370  ;;  %v373_v63 = vpop.xlane.xlu0 %372 }
 0x178   : > { %2206 = vrsqrt.f32 %v416_v61  ;;  %v401_v0 = vmul.f32 0.0078125, %v371_v62  ;;  %v402_v1 = vmul.f32 0.0078125, %v373_v63 }
 0x17a   : > { %v417_v2 = vadd.f32 1e-06, %v401_v0  ;;  %v418_v3 = vadd.f32 1e-06, %v402_v1 }
 0x17b   : > { %v375_v4 = vpop.xlane.xlu1 %374  ;;  %v377_v7 = vpop.xlane.xlu0 %376 }
 0x17c   : > { %2208 = vrsqrt.f32 %v417_v2  ;;  %v403_v8 = vmul.f32 0.0078125, %v375_v4  ;;  %v404_v9 = vmul.f32 0.0078125, %v377_v7 }
 0x17d   : > { %2210 = vrsqrt.f32 %v418_v3 }
 0x17e   : > { %v419_v16 = vadd.f32 1e-06, %v403_v8  ;;  %v420_v17 = vadd.f32 1e-06, %v404_v9 }
 0x17f   : > { %v379_v18 = vpop.xlane.xlu1 %378  ;;  %v381_v19 = vpop.xlane.xlu0 %380 }
 0x180   : > { %2212 = vrsqrt.f32 %v419_v16  ;;  %v405_v10 = vmul.f32 0.0078125, %v379_v18  ;;  %v406_v21 = vmul.f32 0.0078125, %v381_v19 }
 0x181   : > { %2214 = vrsqrt.f32 %v420_v17 }
 0x182   : > { %v2207_v22 = vpop.eup %2206  ;;  %v421_v23 = vadd.f32 1e-06, %v405_v10  ;;  %v422_v24 = vadd.f32 1e-06, %v406_v21 }
 0x183   : > { %v383_v28 = vpop.xlane.xlu1 %382  ;;  %v385_v29 = vpop.xlane.xlu0 %384  ;;  %v448_v30 = vmul.f32 %v2207_v22, %v2556_v26 }
 0x184   : > { %2216 = vrsqrt.f32 %v421_v23  ;;  %v407_v31 = vmul.f32 0.0078125, %v383_v28  ;;  %v408_v12 = vmul.f32 0.0078125, %v385_v29 }
 0x185   : > { %2218 = vrsqrt.f32 %v422_v24  ;;  %v471_v36 = vmul.f32 %v2636_v25, %v448_v30 }
 0x186   : > { %v2209_v37 = vpop.eup %2208  ;;  %v423_v38 = vadd.f32 1e-06, %v407_v31  ;;  %v424_v39 = vadd.f32 1e-06, %v408_v12 }
 0x187   : > { %v2211_v26 = vpop.eup %2210  ;;  %v387_v40 = vpop.xlane.xlu1 %386  ;;  %v449_v15 = vmul.f32 %v2209_v37, %v2562_v33  ;;  %v494_v43 = vadd.f32 %v2642_v35, %v471_v36 }
 0x188   : > { %v389_v14 = vpop.xlane.xlu0 %388  ;;  %2220 = vrsqrt.f32 %v423_v38  ;;  %v409_v44 = vmul.f32 0.0078125, %v387_v40  ;;  %v450_v46 = vmul.f32 %v2211_v26, %v2558_v27 }
 0x189   : > { %v410_v45 = vmul.f32 0.0078125, %v389_v14  ;;  %2222 = vrsqrt.f32 %v424_v39  ;;  %v472_v47 = vmul.f32 %v2636_v25, %v449_v15  ;;  %510 = vst [vmem:[%s2648_s16] sm:$0xff] %v494_v43 }
 0x18a   : > { %v2213_v48 = vpop.eup %2212  ;;  %v425_v51 = vadd.f32 1e-06, %v409_v44  ;;  %v473_v53 = vmul.f32 %v2636_v25, %v450_v46 }
 0x18b   : > { %v426_v52 = vadd.f32 1e-06, %v410_v45  ;;  %v2215_v54 = vpop.eup %2214  ;;  %v391_v55 = vpop.xlane.xlu1 %390  ;;  %v495_v59 = vadd.f32 %v2642_v35, %v472_v47  ;;  %v451_v60 = vmul.f32 %v2213_v48, %v2564_v34 }
 0x18c   : > { %v393_v33 = vpop.xlane.xlu0 %392  ;;  %2224 = vrsqrt.f32 %v425_v51  ;;  %v411_v27 = vmul.f32 0.0078125, %v391_v55  ;;  %v496_v62 = vadd.f32 %v2642_v35, %v473_v53  ;;  %v452_v1 = vmul.f32 %v2215_v54, %v2570_v41 }
 0x18d   : > { %v412_v61 = vmul.f32 0.0078125, %v393_v33  ;;  %2226 = vrsqrt.f32 %v426_v52  ;;  %511 = vst [vmem:[%s2648_s16 + $0x8] sm:$0xff] %v495_v59  ;;  %v526_v63 = vpack.c.bf16 %v495_v59, %v494_v43  ;;  %v474_v0 = vmul.f32 %v2636_v25, %v451_v60 }
 0x18e   : > { %v2217_v2 = vpop.eup %2216  ;;  %v427_v3 = vadd.f32 1e-06, %v411_v27  ;;  %512 = vst [vmem:[%s2648_s16 + $0x10] sm:$0xff] %v496_v62  ;;  %v475_v17 = vmul.f32 %v2636_v25, %v452_v1 }
 0x18f   : > { %v428_v4 = vadd.f32 1e-06, %v412_v61  ;;  %v2219_v7 = vpop.eup %2218  ;;  %v395_v8 = vpop.xlane.xlu1 %394  ;;  %759 = vmatmul.mubr.bf16.vlgmr.msra.gmra.mrb[0].mxu0 %v526_v63  ;;  %872 = vmatmul.mubr.bf16.vlgmr.msra.gmra.mrb[0].mxu1 %v526_v63  ;;  %v497_v9 = vadd.f32 %v2642_v35, %v474_v0  ;;  %v453_v16 = vmul.f32 %v2217_v2, %v2572_v42 }
 0x190   : > { %v397_v34 = vpop.xlane.xlu0 %396  ;;  %2228 = vrsqrt.f32 %v427_v3  ;;  %v413_v18 = vmul.f32 0.0078125, %v395_v8  ;;  %768 = vmatprep.mubr.bf16.mxu0 %v2342_v56  ;;  %881 = vmatprep.mubr.bf16.mxu1 %v2342_v56  ;;  %v454_v19 = vmul.f32 %v2219_v7, %v2579_v49  ;;  %v498_v21 = vadd.f32 %v2642_v35, %v475_v17 }
 0x191   : > { %v414_v41 = vmul.f32 0.0078125, %v397_v34  ;;  %2230 = vrsqrt.f32 %v428_v4  ;;  %513 = vst [vmem:[%s2648_s16 + $0x18] sm:$0xff] %v497_v9  ;;  %v476_v10 = vmul.f32 %v2636_v25, %v453_v16  ;;  %v527_v37 = vpack.c.bf16 %v497_v9, %v496_v62 }
 0x192   : > { %v2221_v42 = vpop.eup %2220  ;;  %v429_v22 = vadd.f32 1e-06, %v413_v18  ;;  %v477_v24 = vmul.f32 %v2636_v25, %v454_v19  ;;  %514 = vst [vmem:[%s2648_s16 + $0x20] sm:$0xff] %v498_v21 }
 0x193   : > { %v430_v23 = vadd.f32 1e-06, %v414_v41  ;;  %v2223_v28 = vpop.eup %2222  ;;  %v399_v29 = vpop.xlane.xlu1 %398  ;;  %v499_v30 = vadd.f32 %v2642_v35, %v476_v10  ;;  %v455_v49 = vmul.f32 %v2221_v42, %v2582_v50 }
 0x194   : > { %2232 = vrsqrt.f32 %v429_v22  ;;  %v415_v31 = vmul.f32 0.0078125, %v399_v29  ;;  %v500_v12 = vadd.f32 %v2642_v35, %v477_v24  ;;  %v456_v36 = vmul.f32 %v2223_v28, %v2589_v57 }
 0x195   : > { %2234 = vrsqrt.f32 %v430_v23  ;;  %515 = vst [vmem:[%s2648_s16 + $0x28] sm:$0xff] %v499_v30  ;;  %v478_v38 = vmul.f32 %v2636_v25, %v455_v49  ;;  %v528_v53 = vpack.c.bf16 %v499_v30, %v498_v21 }
 0x196   : > { %v2225_v39 = vpop.eup %2224  ;;  %v431_v26 = vadd.f32 1e-06, %v415_v31  ;;  %516 = vst [vmem:[%s2648_s16 + $0x30] sm:$0xff] %v500_v12  ;;  %v479_v40 = vmul.f32 %v2636_v25, %v456_v36 }
 0x197   : > { %v2227_v14 = vpop.eup %2226  ;;  %769 = vmatmul.mubr.bf16.gmra.mrb[4].mxu0 %v527_v37  ;;  %882 = vmatmul.mubr.bf16.gmra.mrb[4].mxu1 %v527_v37  ;;  %v501_v50 = vadd.f32 %v2642_v35, %v478_v38  ;;  %v457_v15 = vmul.f32 %v2225_v39, %v2592_v58 }
 0x198   : > { %2236 = vrsqrt.f32 %v431_v26  ;;  %778 = vmatprep.mubr.bf16.mxu0 %v2342_v56  ;;  %891 = vmatprep.mubr.bf16.mxu1 %v2342_v56  ;;  %v502_v57 = vadd.f32 %v2642_v35, %v479_v40  ;;  %v458_v43 = vmul.f32 %v2227_v14, %v2599_v5 }
 0x199   : > { %517 = vst [vmem:[%s2648_s16 + $0x38] sm:$0xff] %v501_v50  ;;  %v480_v44 = vmul.f32 %v2636_v25, %v457_v15  ;;  %v529_v1 = vpack.c.bf16 %v501_v50, %v500_v12 }
 0x19a   : > { %v2229_v45 = vpop.eup %2228  ;;  %518 = vst [vmem:[%s2648_s16 + $0x40] sm:$0xff] %v502_v57  ;;  %v481_v46 = vmul.f32 %v2636_v25, %v458_v43 }
 0x19b   : > { %v2231_v47 = vpop.eup %2230  ;;  %v503_v58 = vadd.f32 %v2642_v35, %v480_v44  ;;  %v459_v48 = vmul.f32 %v2229_v45, %v2602_v6 }
 0x19c   : > { %v504_v51 = vadd.f32 %v2642_v35, %v481_v46  ;;  %v460_v52 = vmul.f32 %v2231_v47, %v2609_v20 }
 0x19d   : > { %519 = vst [vmem:[%s2648_s16 + $0x48] sm:$0xff] %v503_v58  ;;  %v482_v5 = vmul.f32 %v2636_v25, %v459_v48  ;;  %v530_v3 = vpack.c.bf16 %v503_v58, %v502_v57 }
 0x19e   : > { %v2233_v54 = vpop.eup %2232  ;;  %520 = vst [vmem:[%s2648_s16 + $0x50] sm:$0xff] %v504_v51  ;;  %v483_v55 = vmul.f32 %v2636_v25, %v460_v52 }
 0x19f   : > { %v2235_v33 = vpop.eup %2234  ;;  %779 = vmatmul.mubr.bf16.gmra.mrb[8].mxu0 %v528_v53  ;;  %892 = vmatmul.mubr.bf16.gmra.mrb[8].mxu1 %v528_v53  ;;  %v505_v6 = vadd.f32 %v2642_v35, %v482_v5  ;;  %v461_v59 = vmul.f32 %v2233_v54, %v2612_v11 }
 0x1a0   : > { %788 = vmatprep.mubr.bf16.mxu0 %v2342_v56  ;;  %901 = vmatprep.mubr.bf16.mxu1 %v2342_v56  ;;  %v506_v20 = vadd.f32 %v2642_v35, %v483_v55  ;;  %v462_v60 = vmul.f32 %v2235_v33, %v2619_v13 }
 0x1a1   : > { %521 = vst [vmem:[%s2648_s16 + $0x58] sm:$0xff] %v505_v6  ;;  %v484_v27 = vmul.f32 %v2636_v25, %v461_v59 }
 0x1a2   : > { %v2237_v61 = vpop.eup %2236  ;;  %522 = vst [vmem:[%s2648_s16 + $0x60] sm:$0xff] %v506_v20  ;;  %v485_v62 = vmul.f32 %v2636_v25, %v462_v60 }
 0x1a3   : > { %v507_v63 = vadd.f32 %v2642_v35, %v484_v27  ;;  %v463_v11 = vmul.f32 %v2237_v61, %v2622_v32  ;;  %v531_v32 = vpack.c.bf16 %v505_v6, %v504_v51 }
 0x1a4   : > { %v508_v0 = vadd.f32 %v2642_v35, %v485_v62 }
 0x1a5   : > { %523 = vst [vmem:[%s2648_s16 + $0x68] sm:$0xff] %v507_v63  ;;  %v486_v2 = vmul.f32 %v2636_v25, %v463_v11  ;;  %v532_v25 = vpack.c.bf16 %v507_v63, %v506_v20 }
 0x1a6   : > { %524 = vst [vmem:[%s2648_s16 + $0x70] sm:$0xff] %v508_v0 }
 0x1a7   : > { %789 = vmatmul.mubr.bf16.gmra.mrb[12].mxu0 %v529_v1  ;;  %902 = vmatmul.mubr.bf16.gmra.mrb[12].mxu1 %v529_v1  ;;  %v509_v13 = vadd.f32 %v2642_v35, %v486_v2 }
 0x1a8   : > { %798 = vmatprep.mubr.bf16.mxu0 %v2342_v56  ;;  %911 = vmatprep.mubr.bf16.mxu1 %v2342_v56 }
 0x1a9   : > { %525 = vst [vmem:[%s2648_s16 + $0x78] sm:$0xff] %v509_v13  ;;  %v533_v35 = vpack.c.bf16 %v509_v13, %v508_v0 }
 0x1af   : > { %799 = vmatmul.mubr.bf16.gmra.mrb[16].mxu0 %v530_v3  ;;  %912 = vmatmul.mubr.bf16.gmra.mrb[16].mxu1 %v530_v3 }
 0x1b0   : > { %808 = vmatprep.mubr.bf16.mxu0 %v2342_v56  ;;  %921 = vmatprep.mubr.bf16.mxu1 %v2342_v56 }
 0x1b7   : > { %809 = vmatmul.mubr.bf16.gmra.mrb[20].mxu0 %v531_v32  ;;  %922 = vmatmul.mubr.bf16.gmra.mrb[20].mxu1 %v531_v32 }
 0x1b8   : > { %818 = vmatprep.mubr.bf16.mxu0 %v2342_v56  ;;  %931 = vmatprep.mubr.bf16.mxu1 %v2342_v56 }
 0x1bf   : > { %819 = vmatmul.mubr.bf16.gmra.mrb[24].mxu0 %v532_v25  ;;  %932 = vmatmul.mubr.bf16.gmra.mrb[24].mxu1 %v532_v25 }
 0x1c0   : > { %828 = vmatprep.mubr.bf16.mxu0 %v2342_v56  ;;  %941 = vmatprep.mubr.bf16.mxu1 %v2342_v56 }
 0x1c7   : > { %829 = vmatmul.mubr.bf16.gmra.mrb[28].mxu0 %v533_v35  ;;  %942 = vmatmul.mubr.bf16.gmra.mrb[28].mxu1 %v533_v35 }
 0x262   : > { %v760_v4 = vpop.f32.mrb[0].mxu0  ;;  %v873_v7 = vpop.f32.mrb[0].mxu1 }
 0x263   : > { %v762_v8 = vpop.f32.mrb[1].mxu0  ;;  %v875_v34 = vpop.f32.mrb[1].mxu1 }
 0x264   : > { %v764_v9 = vpop.f32.mrb[2].mxu0  ;;  %v877_v16 = vpop.f32.mrb[2].mxu1 }
 0x265   : > { %v1915_v17 = vpack.c.bf16 %v764_v9, %v760_v4  ;;  %v1995_v18 = vpack.c.bf16 %v877_v16, %v873_v7  ;;  %v766_v41 = vpop.f32.mrb[3].mxu0  ;;  %v879_v19 = vpop.f32.mrb[3].mxu1 }
 0x266   : > { %v1955_v10 = vpack.c.bf16 %v766_v41, %v762_v8  ;;  %v2035_v21 = vpack.c.bf16 %v879_v19, %v875_v34 }
 0x267   : > { %1916 = vst [vmem:[%s2727_s30] sm:$0xff] %v1915_v17   ;;  %2087 = vst [vmem:[%s2727_s30 + $0x80] sm:$0xff] %v1995_v18  }
 0x268   : > { %2079 = vst [vmem:[%s2727_s30 + $0x40] sm:$0xff] %v1955_v10   ;;  %2095 = vst [vmem:[%s2727_s30 + $0xc0] sm:$0xff] %v2035_v21  }
 0x26a   : > { %v770_v56 = vpop.f32.mrb[4].mxu0  ;;  %v883_v42 = vpop.f32.mrb[4].mxu1 }
 0x26b   : > { %v772_v22 = vpop.f32.mrb[5].mxu0  ;;  %v885_v23 = vpop.f32.mrb[5].mxu1 }
 0x26c   : > { %v774_v24 = vpop.f32.mrb[6].mxu0  ;;  %v887_v28 = vpop.f32.mrb[6].mxu1 }
 0x26d   : > { %v1920_v29 = vpack.c.bf16 %v774_v24, %v770_v56  ;;  %v2000_v30 = vpack.c.bf16 %v887_v28, %v883_v42  ;;  %v776_v49 = vpop.f32.mrb[7].mxu0  ;;  %v889_v31 = vpop.f32.mrb[7].mxu1 }
 0x26e   : > { %v1960_v12 = vpack.c.bf16 %v776_v49, %v772_v22  ;;  %v2040_v36 = vpack.c.bf16 %v889_v31, %v885_v23 }
 0x26f   : > { %2072 = vst [vmem:[%s2727_s30 + $0x8] sm:$0xff] %v1920_v29   ;;  %2088 = vst [vmem:[%s2727_s30 + $0x88] sm:$0xff] %v2000_v30  }
 0x270   : > { %2080 = vst [vmem:[%s2727_s30 + $0x48] sm:$0xff] %v1960_v12   ;;  %2096 = vst [vmem:[%s2727_s30 + $0xc8] sm:$0xff] %v2040_v36  }
 0x272   : > { %v780_v37 = vpop.f32.mrb[8].mxu0  ;;  %v893_v38 = vpop.f32.mrb[8].mxu1 }
 0x273   : > { %v782_v39 = vpop.f32.mrb[9].mxu0  ;;  %v895_v26 = vpop.f32.mrb[9].mxu1 }
 0x274   : > { %v784_v40 = vpop.f32.mrb[10].mxu0  ;;  %v897_v14 = vpop.f32.mrb[10].mxu1 }
 0x275   : > { %v1925_v50 = vpack.c.bf16 %v784_v40, %v780_v37  ;;  %v2005_v15 = vpack.c.bf16 %v897_v14, %v893_v38  ;;  %v786_v57 = vpop.f32.mrb[11].mxu0  ;;  %v899_v43 = vpop.f32.mrb[11].mxu1 }
 0x276   : > { %v1965_v44 = vpack.c.bf16 %v786_v57, %v782_v39  ;;  %v2045_v45 = vpack.c.bf16 %v899_v43, %v895_v26  ;;  %v1309_v57 = vld [vmem:[%s2727_s30] sm:$0xff] (%p2447_p10)   ;;  %v1313_v43 = vld [vmem:[%s2727_s30 + $0x8] sm:$0xff] (%p2447_p10)  }
 0x277   : > { %2073 = vst [vmem:[%s2727_s30 + $0x10] sm:$0xff] %v1925_v50   ;;  %2089 = vst [vmem:[%s2727_s30 + $0x90] sm:$0xff] %v2005_v15  }
 0x278   : > { %2081 = vst [vmem:[%s2727_s30 + $0x50] sm:$0xff] %v1965_v44   ;;  %2097 = vst [vmem:[%s2727_s30 + $0xd0] sm:$0xff] %v2045_v45  }
 0x279   : > { %1310 = vst [vmem:[%s2770_s8] sm:$0xff] (%p2447_p10), %v1309_v57   ;;  %1314 = vst [vmem:[%s2770_s8 + $0x8] sm:$0xff] (%p2447_p10), %v1313_v43  }
 0x27a   : > { %v790_v46 = vpop.f32.mrb[12].mxu0  ;;  %v903_v47 = vpop.f32.mrb[12].mxu1 }
 0x27b   : > { %v792_v58 = vpop.f32.mrb[13].mxu0  ;;  %v905_v48 = vpop.f32.mrb[13].mxu1 }
 0x27c   : > { %v794_v51 = vpop.f32.mrb[14].mxu0  ;;  %v907_v52 = vpop.f32.mrb[14].mxu1 }
 0x27d   : > { %v1930_v53 = vpack.c.bf16 %v794_v51, %v790_v46  ;;  %v2010_v5 = vpack.c.bf16 %v907_v52, %v903_v47  ;;  %v796_v54 = vpop.f32.mrb[15].mxu0  ;;  %v909_v55 = vpop.f32.mrb[15].mxu1  ;;  %v1341_v51 = vld [vmem:[%s2727_s30 + $0x40] sm:$0xff] (%p2447_p10)   ;;  %v1345_v52 = vld [vmem:[%s2727_s30 + $0x48] sm:$0xff] (%p2447_p10)  }
 0x27e   : > { %v1970_v33 = vpack.c.bf16 %v796_v54, %v792_v58  ;;  %v2050_v6 = vpack.c.bf16 %v909_v55, %v905_v48  ;;  %v1317_v44 = vld [vmem:[%s2727_s30 + $0x10] sm:$0xff] (%p2447_p10)   ;;  %1342 = vst [vmem:[%s2770_s8 + $0x80] sm:$0xff] (%p2447_p10), %v1341_v51   ;;  %1346 = vst [vmem:[%s2770_s8 + $0x88] sm:$0xff] (%p2447_p10), %v1345_v52  }
 0x27f   : > { %2074 = vst [vmem:[%s2727_s30 + $0x18] sm:$0xff] %v1930_v53   ;;  %2090 = vst [vmem:[%s2727_s30 + $0x98] sm:$0xff] %v2010_v5   ;;  %v1349_v53 = vld [vmem:[%s2727_s30 + $0x50] sm:$0xff] (%p2447_p10)  }
 0x280   : > { %2082 = vst [vmem:[%s2727_s30 + $0x58] sm:$0xff] %v1970_v33   ;;  %2098 = vst [vmem:[%s2727_s30 + $0xd8] sm:$0xff] %v2050_v6  }
 0x281   : > { %1318 = vst [vmem:[%s2770_s8 + $0x10] sm:$0xff] (%p2447_p10), %v1317_v44   ;;  %1350 = vst [vmem:[%s2770_s8 + $0x90] sm:$0xff] (%p2447_p10), %v1349_v53  }
 0x282   : > { %v800_v59 = vpop.f32.mrb[16].mxu0  ;;  %v913_v20 = vpop.f32.mrb[16].mxu1 }
 0x283   : > { %v802_v60 = vpop.f32.mrb[17].mxu0  ;;  %v915_v27 = vpop.f32.mrb[17].mxu1 }
 0x284   : > { %v804_v61 = vpop.f32.mrb[18].mxu0  ;;  %v917_v62 = vpop.f32.mrb[18].mxu1 }
 0x285   : > { %v1935_v63 = vpack.c.bf16 %v804_v61, %v800_v59  ;;  %v2015_v11 = vpack.c.bf16 %v917_v62, %v913_v20  ;;  %v806_v0 = vpop.f32.mrb[19].mxu0  ;;  %v919_v1 = vpop.f32.mrb[19].mxu1  ;;  %v1373_v59 = vld [vmem:[%s2727_s30 + $0x80] sm:$0xff] (%p2447_p10)   ;;  %v1377_v20 = vld [vmem:[%s2727_s30 + $0x88] sm:$0xff] (%p2447_p10)  }
 0x286   : > { %v1975_v2 = vpack.c.bf16 %v806_v0, %v802_v60  ;;  %v2055_v13 = vpack.c.bf16 %v919_v1, %v915_v27  ;;  %v1321_v45 = vld [vmem:[%s2727_s30 + $0x18] sm:$0xff] (%p2447_p10)   ;;  %1374 = vst [vmem:[%s2770_s8 + $0x100] sm:$0xff] (%p2447_p10), %v1373_v59   ;;  %1378 = vst [vmem:[%s2770_s8 + $0x108] sm:$0xff] (%p2447_p10), %v1377_v20   ;;  %v1381_v60 = vld [vmem:[%s2727_s30 + $0x90] sm:$0xff] (%p2447_p10)  }
 0x287   : > { %2075 = vst [vmem:[%s2727_s30 + $0x20] sm:$0xff] %v1935_v63   ;;  %2091 = vst [vmem:[%s2727_s30 + $0xa0] sm:$0xff] %v2015_v11   ;;  %v1353_v5 = vld [vmem:[%s2727_s30 + $0x58] sm:$0xff] (%p2447_p10)   ;;  %v1405_v0 = vld [vmem:[%s2727_s30 + $0xc0] sm:$0xff] (%p2447_p10)  }
 0x288   : > { %2083 = vst [vmem:[%s2727_s30 + $0x60] sm:$0xff] %v1975_v2   ;;  %2099 = vst [vmem:[%s2727_s30 + $0xe0] sm:$0xff] %v2055_v13   ;;  %v1385_v27 = vld [vmem:[%s2727_s30 + $0x98] sm:$0xff] (%p2447_p10)   ;;  %v1409_v1 = vld [vmem:[%s2727_s30 + $0xc8] sm:$0xff] (%p2447_p10)  }
 0x289   : > { %1322 = vst [vmem:[%s2770_s8 + $0x18] sm:$0xff] (%p2447_p10), %v1321_v45   ;;  %1354 = vst [vmem:[%s2770_s8 + $0x98] sm:$0xff] (%p2447_p10), %v1353_v5   ;;  %v1413_v2 = vld [vmem:[%s2727_s30 + $0xd0] sm:$0xff] (%p2447_p10)   ;;  %v1417_v13 = vld [vmem:[%s2727_s30 + $0xd8] sm:$0xff] (%p2447_p10)  }
 0x28a   : > { %v810_v3 = vpop.f32.mrb[20].mxu0  ;;  %v923_v32 = vpop.f32.mrb[20].mxu1  ;;  %1382 = vst [vmem:[%s2770_s8 + $0x110] sm:$0xff] (%p2447_p10), %v1381_v60   ;;  %1386 = vst [vmem:[%s2770_s8 + $0x118] sm:$0xff] (%p2447_p10), %v1385_v27  }
 0x28b   : > { %v812_v25 = vpop.f32.mrb[21].mxu0  ;;  %v925_v35 = vpop.f32.mrb[21].mxu1  ;;  %1406 = vst [vmem:[%s2770_s8 + $0x180] sm:$0xff] (%p2447_p10), %v1405_v0   ;;  %1410 = vst [vmem:[%s2770_s8 + $0x188] sm:$0xff] (%p2447_p10), %v1409_v1  }
 0x28c   : > { %v814_v4 = vpop.f32.mrb[22].mxu0  ;;  %v927_v7 = vpop.f32.mrb[22].mxu1  ;;  %1414 = vst [vmem:[%s2770_s8 + $0x190] sm:$0xff] (%p2447_p10), %v1413_v2   ;;  %1418 = vst [vmem:[%s2770_s8 + $0x198] sm:$0xff] (%p2447_p10), %v1417_v13  }
 0x28d   : > { %v1940_v8 = vpack.c.bf16 %v814_v4, %v810_v3  ;;  %v2020_v34 = vpack.c.bf16 %v927_v7, %v923_v32  ;;  %v816_v9 = vpop.f32.mrb[23].mxu0  ;;  %v929_v16 = vpop.f32.mrb[23].mxu1 }
 0x28e   : > { %v1980_v17 = vpack.c.bf16 %v816_v9, %v812_v25  ;;  %v2060_v18 = vpack.c.bf16 %v929_v16, %v925_v35  ;;  %v1325_v46 = vld [vmem:[%s2727_s30 + $0x20] sm:$0xff] (%p2447_p10)  }
 0x28f   : > { %2076 = vst [vmem:[%s2727_s30 + $0x28] sm:$0xff] %v1940_v8   ;;  %2092 = vst [vmem:[%s2727_s30 + $0xa8] sm:$0xff] %v2020_v34   ;;  %v1357_v54 = vld [vmem:[%s2727_s30 + $0x60] sm:$0xff] (%p2447_p10)  }
 0x290   : > { %2084 = vst [vmem:[%s2727_s30 + $0x68] sm:$0xff] %v1980_v17   ;;  %2100 = vst [vmem:[%s2727_s30 + $0xe8] sm:$0xff] %v2060_v18   ;;  %v1389_v61 = vld [vmem:[%s2727_s30 + $0xa0] sm:$0xff] (%p2447_p10)  }
 0x291   : > { %1326 = vst [vmem:[%s2770_s8 + $0x20] sm:$0xff] (%p2447_p10), %v1325_v46   ;;  %1358 = vst [vmem:[%s2770_s8 + $0xa0] sm:$0xff] (%p2447_p10), %v1357_v54   ;;  %v1421_v3 = vld [vmem:[%s2727_s30 + $0xe0] sm:$0xff] (%p2447_p10)  }
 0x292   : > { %v820_v41 = vpop.f32.mrb[24].mxu0  ;;  %v933_v19 = vpop.f32.mrb[24].mxu1  ;;  %1390 = vst [vmem:[%s2770_s8 + $0x120] sm:$0xff] (%p2447_p10), %v1389_v61   ;;  %1422 = vst [vmem:[%s2770_s8 + $0x1a0] sm:$0xff] (%p2447_p10), %v1421_v3  }
 0x293   : > { %v822_v10 = vpop.f32.mrb[25].mxu0  ;;  %v935_v21 = vpop.f32.mrb[25].mxu1 }
 0x294   : > { %v824_v56 = vpop.f32.mrb[26].mxu0  ;;  %v937_v42 = vpop.f32.mrb[26].mxu1 }
 0x295   : > { %v1945_v22 = vpack.c.bf16 %v824_v56, %v820_v41  ;;  %v2025_v23 = vpack.c.bf16 %v937_v42, %v933_v19  ;;  %v826_v24 = vpop.f32.mrb[27].mxu0  ;;  %v939_v28 = vpop.f32.mrb[27].mxu1 }
 0x296   : > { %v1985_v29 = vpack.c.bf16 %v826_v24, %v822_v10  ;;  %v2065_v30 = vpack.c.bf16 %v939_v28, %v935_v21  ;;  %v1329_v47 = vld [vmem:[%s2727_s30 + $0x28] sm:$0xff] (%p2447_p10)  }
 0x297   : > { %2077 = vst [vmem:[%s2727_s30 + $0x30] sm:$0xff] %v1945_v22   ;;  %2093 = vst [vmem:[%s2727_s30 + $0xb0] sm:$0xff] %v2025_v23   ;;  %v1361_v55 = vld [vmem:[%s2727_s30 + $0x68] sm:$0xff] (%p2447_p10)  }
 0x298   : > { %2085 = vst [vmem:[%s2727_s30 + $0x70] sm:$0xff] %v1985_v29   ;;  %2101 = vst [vmem:[%s2727_s30 + $0xf0] sm:$0xff] %v2065_v30   ;;  %v1393_v62 = vld [vmem:[%s2727_s30 + $0xa8] sm:$0xff] (%p2447_p10)  }
 0x299   : > { %1330 = vst [vmem:[%s2770_s8 + $0x28] sm:$0xff] (%p2447_p10), %v1329_v47   ;;  %1362 = vst [vmem:[%s2770_s8 + $0xa8] sm:$0xff] (%p2447_p10), %v1361_v55   ;;  %v1425_v32 = vld [vmem:[%s2727_s30 + $0xe8] sm:$0xff] (%p2447_p10)  }
 0x29a   : > { %v830_v49 = vpop.f32.mrb[28].mxu0  ;;  %v943_v31 = vpop.f32.mrb[28].mxu1  ;;  %1290 = sbr.rel (!%p2447_p10) target bundleno = 683 (0x2ab), region = 52  ;;  %1394 = vst [vmem:[%s2770_s8 + $0x128] sm:$0xff] (%p2447_p10), %v1393_v62   ;;  %1426 = vst [vmem:[%s2770_s8 + $0x1a8] sm:$0xff] (%p2447_p10), %v1425_v32  }
 0x29b   : > { %v832_v12 = vpop.f32.mrb[29].mxu0  ;;  %v945_v36 = vpop.f32.mrb[29].mxu1 }
 0x29c   : > { %v834_v37 = vpop.f32.mrb[30].mxu0  ;;  %v947_v38 = vpop.f32.mrb[30].mxu1 }
 0x29d   : > { %v1950_v39 = vpack.c.bf16 %v834_v37, %v830_v49  ;;  %v2030_v26 = vpack.c.bf16 %v947_v38, %v943_v31  ;;  %v836_v40 = vpop.f32.mrb[31].mxu0  ;;  %v949_v14 = vpop.f32.mrb[31].mxu1 }
 0x29e   : > { %v1990_v50 = vpack.c.bf16 %v836_v40, %v832_v12  ;;  %v2070_v15 = vpack.c.bf16 %v949_v14, %v945_v36  ;;  %v1333_v58 = vld [vmem:[%s2727_s30 + $0x30] sm:$0xff] (%p2447_p10)  }
 0x29f   : > { %2078 = vst [vmem:[%s2727_s30 + $0x38] sm:$0xff] %v1950_v39   ;;  %2094 = vst [vmem:[%s2727_s30 + $0xb8] sm:$0xff] %v2030_v26   ;;  %v1365_v33 = vld [vmem:[%s2727_s30 + $0x70] sm:$0xff] (%p2447_p10)  }
 0x2a0   : > { %2086 = vst [vmem:[%s2727_s30 + $0x78] sm:$0xff] %v1990_v50   ;;  %2102 = vst [vmem:[%s2727_s30 + $0xf8] sm:$0xff] %v2070_v15   ;;  %v1397_v63 = vld [vmem:[%s2727_s30 + $0xb0] sm:$0xff] (%p2447_p10)  }
 0x2a1   : > { %1334 = vst [vmem:[%s2770_s8 + $0x30] sm:$0xff] %v1333_v58   ;;  %1366 = vst [vmem:[%s2770_s8 + $0xb0] sm:$0xff] %v1365_v33   ;;  %v1429_v25 = vld [vmem:[%s2727_s30 + $0xf0] sm:$0xff]  }
 0x2a2   : > { %1398 = vst [vmem:[%s2770_s8 + $0x130] sm:$0xff] %v1397_v63   ;;  %1430 = vst [vmem:[%s2770_s8 + $0x1b0] sm:$0xff] %v1429_v25  }
 0x2a6   : > { %v1337_v48 = vld [vmem:[%s2727_s30 + $0x38] sm:$0xff]  }
 0x2a7   : > { %1338 = vst [vmem:[%s2770_s8 + $0x38] sm:$0xff] %v1337_v48   ;;  %v1369_v6 = vld [vmem:[%s2727_s30 + $0x78] sm:$0xff]  }
 0x2a8   : > { %1370 = vst [vmem:[%s2770_s8 + $0xb8] sm:$0xff] %v1369_v6   ;;  %v1401_v11 = vld [vmem:[%s2727_s30 + $0xb8] sm:$0xff]  }
 0x2a9   : > { %1402 = vst [vmem:[%s2770_s8 + $0x138] sm:$0xff] %v1401_v11   ;;  %v1433_v35 = vld [vmem:[%s2727_s30 + $0xf8] sm:$0xff]  }
 0x2aa   : > { %1434 = vst [vmem:[%s2770_s8 + $0x1b8] sm:$0xff] %v1433_v35  }
 0x2ab PF: > { %s2865_s22 = smov %s2443_s18  ;;  %p17_p10 = scmp.ge.s32.totalorder %s2418_s28, 4  }
 0x2ac   : > { %s2866_s18 = smov %s2326_s19  ;;  %s2867_s19 = smov %s2330_s20 }
 0x2ad   : > { %s2868_s20 = smov %s2865_s22  ;;  %s2869_s21 = smov %s2418_s28 }
 0x2ae   :  { %19 = sbr.rel (!%p17_p10) target bundleno = 4 (0x4), region = 136 }
 0x2b5   :  { %1605 = vsyncpa [#allocation3], 1 }
 0x2b6   :  { %1607 = vsyncpa [#allocation3 + $0x1], 1 }
 0x2b7   :  { %1608 = vsyncpa [#allocation5], 1 }

</bundles_post_ra>
